<compile_context>
chip_gen: v6e
topology: v6e:2x2x1
jax: 0.10.0
libtpu: 0.0.40
codegen_flags: <defaults>
</compile_context>

<pallas_src>
import functools

import jax
import jax.numpy as jnp
from jax import lax
from jax.experimental import pallas as pl
from jax.experimental.pallas import tpu as pltpu


def _round_up(n, m):
    return ((n + m - 1) // m) * m


def _gru_recurrence_kernel(gx_ref, whh_ref, bhhn_ref, wfc_ref, bfc_ref,
                           out_ref, h_ref, *, hp, chunk, seq_len, needs_mask):
    """One grid step = `chunk` timesteps of the recurrence.

    gx_ref  : (chunk, B, 3*Hp) precomputed x@W_ih^T with biases folded in (f32)
    whh_ref : (Hp, 3*Hp) recurrent weights (gate-block lane-padded)
    bhhn_ref: (1, Hp)    hidden bias of the n gate
    wfc_ref : (Hp, O)    final Linear weight (rows >= H are zero)
    bfc_ref : (1, O)
    h_ref   : (B, Hp)    VMEM scratch carrying h across grid steps
    """
    c = pl.program_id(0)

    @pl.when(c == 0)
    def _():
        h_ref[...] = jnp.zeros_like(h_ref)

    whh = whh_ref[...]          # (Hp, 3*Hp)
    bhh_n = bhhn_ref[...]       # (1, Hp)

    def step(i, h):
        gx = gx_ref[i]          # (B, 3*Hp), biases already folded in
        gh = jnp.dot(h.astype(whh.dtype), whh,
                     preferred_element_type=jnp.float32)        # (B, 3*Hp)
        # gate order [r | z | n], each block Hp lanes wide (lane-aligned slices)
        r = jax.nn.sigmoid(gx[:, 0 * hp:1 * hp] + gh[:, 0 * hp:1 * hp])
        z = jax.nn.sigmoid(gx[:, 1 * hp:2 * hp] + gh[:, 1 * hp:2 * hp])
        n = jnp.tanh(gx[:, 2 * hp:3 * hp] + r * (gh[:, 2 * hp:3 * hp] + bhh_n))
        h_new = n + z * (h - n)                 # == (1 - z) * n + z * h
        if needs_mask:                          # static: only if S was padded
            h_new = jnp.where(c * chunk + i < seq_len, h_new, h)
        return h_new

    h_out = lax.fori_loop(0, chunk, step, h_ref[...], unroll=(chunk <= 16))
    h_ref[...] = h_out

    @pl.when(c == pl.num_programs(0) - 1)
    def _():
        fc = jnp.dot(h_out.astype(whh.dtype), wfc_ref[...],
                     preferred_element_type=jnp.float32) + bfc_ref[...]
        out_ref[...] = fc.astype(out_ref.dtype)


def gru_forward(x, params, *, seq_chunk=None, compute_dtype=jnp.float32):
    """x: (batch, seq, input_size) float32. Returns (batch, hidden_size)."""
    B, S, I = x.shape
    w_ih, w_hh, b_ih, b_hh, w_fc, b_fc = (
        params["w_ih"], params["w_hh"], params["b_ih"],
        params["b_hh"], params["w_fc"], params["b_fc"],
    )
    H = w_hh.shape[1]
    O = w_fc.shape[0]
    Hp = _round_up(H, 128)          # lane-pad each gate block to a 128 multiple
    Gp = 3 * Hp
    f32 = jnp.float32

    # --- gate-block-padded weight layouts (pad lanes are zero -> h pad lanes stay 0)
    w_ih_t_pad = jnp.zeros((I, Gp), f32)
    w_hh_t_pad = jnp.zeros((Hp, Gp), f32)
    bias_x_pad = jnp.zeros((Gp,), f32)          # b_ih (+ b_hh for r,z) folded into gx
    for g in range(3):
        w_ih_t_pad = w_ih_t_pad.at[:, g * Hp:g * Hp + H].set(w_ih[g * H:(g + 1) * H, :].T)
        w_hh_t_pad = w_hh_t_pad.at[:H, g * Hp:g * Hp + H].set(w_hh[g * H:(g + 1) * H, :].T)
        b = b_ih[g * H:(g + 1) * H]
        if g < 2:                               # r, z: hidden bias can be pre-added
            b = b + b_hh[g * H:(g + 1) * H]
        bias_x_pad = bias_x_pad.at[g * Hp:g * Hp + H].set(b)
    bhh_n_pad = jnp.zeros((1, Hp), f32).at[0, :H].set(b_hh[2 * H:3 * H])
    w_fc_t_pad = jnp.zeros((Hp, O), f32).at[:H, :].set(w_fc.T)
    b_fc2 = b_fc.reshape(1, O).astype(f32)

    # --- hoisted, time-independent input projection: one big MXU matmul (wrapper) ---
    # (B,S,I) @ (I,3*Hp) -> time-major (S, B, 3*Hp); all x-side biases folded in.
    gx = jnp.einsum('bsi,ig->sbg', x.astype(f32), w_ih_t_pad) + bias_x_pad

    # --- chunk the time axis: amortize grid overhead, bound the resident gx slab ---
    if seq_chunk is None:
        step_bytes = B * Gp * 4
        seq_chunk = int(max(1, min(S, (4 * 1024 * 1024) // step_bytes)))
    n_chunks = pl.cdiv(S, seq_chunk)
    S_pad = n_chunks * seq_chunk
    if S_pad != S:
        gx = jnp.pad(gx, ((0, S_pad - S), (0, 0), (0, 0)))

    whh_c = w_hh_t_pad.astype(compute_dtype)    # bf16 here on v6e/v7x at large H
    wfc_c = w_fc_t_pad.astype(compute_dtype)

    kernel = functools.partial(
        _gru_recurrence_kernel,
        hp=Hp, chunk=seq_chunk, seq_len=S, needs_mask=(S_pad != S))

    cost = pl.CostEstimate(
        flops=2 * S * B * Hp * Gp + 2 * B * Hp * O,
        transcendentals=3 * S * B * Hp,
        bytes_accessed=int(gx.size * 4 + whh_c.size * whh_c.dtype.itemsize
                           + wfc_c.size * wfc_c.dtype.itemsize + B * O * 4),
    )

    return pl.pallas_call(
        kernel,
        out_shape=jax.ShapeDtypeStruct((B, O), x.dtype),
        grid_spec=pltpu.PrefetchScalarGridSpec(
            num_scalar_prefetch=0,
            grid=(n_chunks,),
            in_specs=[
                pl.BlockSpec((seq_chunk, B, Gp), lambda c: (c, 0, 0)),   # gx chunk
                pl.BlockSpec((Hp, Gp), lambda c: (0, 0)),                # W_hh^T (padded)
                pl.BlockSpec((1, Hp), lambda c: (0, 0)),                 # b_hh (n gate)
                pl.BlockSpec((Hp, O), lambda c: (0, 0)),                 # W_fc^T (padded)
                pl.BlockSpec((1, O), lambda c: (0, 0)),                  # b_fc
            ],
            out_specs=pl.BlockSpec((B, O), lambda c: (0, 0)),
            scratch_shapes=[pltpu.VMEM((B, Hp), jnp.float32)],           # carried h
        ),
        compiler_params=pltpu.CompilerParams(
            dimension_semantics=("arbitrary",)),    # time recurrence is sequential
        cost_estimate=cost,
    )(gx, whh_c, bhh_n_pad, wfc_c, b_fc2)


def gru_reference(x, params):
    """Plain-JAX reference (mirrors torch.nn.GRU equations)."""
    w_ih, w_hh, b_ih, b_hh, w_fc, b_fc = (
        params["w_ih"], params["w_hh"], params["b_ih"],
        params["b_hh"], params["w_fc"], params["b_fc"],
    )
    B, S, I = x.shape
    H = w_hh.shape[1]
    h = jnp.zeros((B, H), jnp.float32)

    def step(h, x_t):
        gx = x_t @ w_ih.T + b_ih
        gh = h @ w_hh.T + b_hh
        r = jax.nn.sigmoid(gx[:, :H] + gh[:, :H])
        z = jax.nn.sigmoid(gx[:, H:2 * H] + gh[:, H:2 * H])
        n = jnp.tanh(gx[:, 2 * H:] + r * gh[:, 2 * H:])
        h_new = (1.0 - z) * n + z * h
        return h_new, None

    h_final, _ = jax.lax.scan(step, h, jnp.transpose(x, (1, 0, 2)))
    return h_final @ w_fc.T + b_fc


def init_params(key, input_size, hidden_size):
    # PyTorch-style uniform(-1/sqrt(H), 1/sqrt(H)) init, deterministic.
    k = 1.0 / jnp.sqrt(jnp.float32(hidden_size))
    keys = jax.random.split(key, 6)
    u = lambda kk, shape: jax.random.uniform(kk, shape, jnp.float32, -k, k)
    return {
        "w_ih": u(keys[0], (3 * hidden_size, input_size)),
        "w_hh": u(keys[1], (3 * hidden_size, hidden_size)),
        "b_ih": u(keys[2], (3 * hidden_size,)),
        "b_hh": u(keys[3], (3 * hidden_size,)),
        # fc = nn.Linear(input_size, hidden_size)
        "w_fc": u(keys[4], (hidden_size, input_size)),
        "b_fc": u(keys[5], (hidden_size,)),
    }


if __name__ == "__main__":
    # The PyTorch module applies fc(input_size -> hidden_size) to hn(hidden_size),
    # so it only runs with input_size == hidden_size.
    batch, seq, input_size, hidden_size = 2, 8, 32, 32

    key = jax.random.PRNGKey(0)
    kx, kp = jax.random.split(key)
    x = jax.random.normal(kx, (batch, seq, input_size), jnp.float32)
    params = init_params(kp, input_size, hidden_size)

    out = gru_forward(x, params)
    out = jax.block_until_ready(out)

    ref = jax.block_until_ready(gru_reference(x, params))
    assert out.shape == (batch, hidden_size)
    assert jnp.allclose(out, ref, atol=1e-4, rtol=1e-4), "mismatch vs JAX reference"

    print("KERNEL_OK")
</pallas_src>

<mosaic_0001>
module attributes {stable_mosaic.version = 11 : i64} {
  func.func @_gru_recurrence_kernel(%arg0: i32, %arg1: memref<8x2x384xf32, #tpu.memory_space<vmem>>, %arg2: memref<128x384xf32, #tpu.memory_space<vmem>>, %arg3: memref<1x128xf32, #tpu.memory_space<vmem>>, %arg4: memref<128x32xf32, #tpu.memory_space<vmem>>, %arg5: memref<1x32xf32, #tpu.memory_space<vmem>>, %arg6: memref<2x32xf32, #tpu.memory_space<vmem>>, %arg7: memref<2x128xf32, #tpu.memory_space<vmem>>) attributes {dimension_semantics = [#tpu.dimension_semantics<arbitrary>], iteration_bounds = array<i64: 1>, scalar_prefetch = 0 : i64, scratch_operands = 1 : i64, tpu.core_type = #tpu.core_type<tc>, window_params = [{transform_indices = @transform_0, window_bounds = array<i64: 8, 2, 384>}, {pipeline_mode = #tpu.pipeline_mode<synchronous>, transform_indices = @transform_1, window_bounds = array<i64: 128, 384>}, {pipeline_mode = #tpu.pipeline_mode<synchronous>, transform_indices = @transform_2, window_bounds = array<i64: 1, 128>}, {pipeline_mode = #tpu.pipeline_mode<synchronous>, transform_indices = @transform_3, window_bounds = array<i64: 128, 32>}, {pipeline_mode = #tpu.pipeline_mode<synchronous>, transform_indices = @transform_4, window_bounds = array<i64: 1, 32>}, {pipeline_mode = #tpu.pipeline_mode<synchronous>, transform_indices = @transform_5, window_bounds = array<i64: 2, 32>}]} {
    %c0_i32 = arith.constant 0 : i32
    %0 = arith.cmpi eq, %arg0, %c0_i32 : i32
    %1 = arith.extui %0 : i1 to i32
    %c0_i32_0 = arith.constant 0 : i32
    %2 = arith.cmpi ne, %1, %c0_i32_0 : i32
    scf.if %2 {
      %cst_50 = arith.constant 0.000000e+00 : f32
      %250 = vector.broadcast %cst_50 : f32 to vector<2x128xf32>
      %c0_51 = arith.constant 0 : index
      %c0_52 = arith.constant 0 : index
      %251 = vector.load %arg7[%c0_51, %c0_52] : memref<2x128xf32, #tpu.memory_space<vmem>>, vector<2x128xf32>
      tpu.vector_store %arg7[%c0_51, %c0_52], %250 {strides = array<i32>} : memref<2x128xf32, #tpu.memory_space<vmem>>, vector<2x128xf32>,
    } else {
    }
    %c0 = arith.constant 0 : index
    %c0_1 = arith.constant 0 : index
    %3 = vector.load %arg2[%c0, %c0_1] : memref<128x384xf32, #tpu.memory_space<vmem>>, vector<128x384xf32>
    %c0_2 = arith.constant 0 : index
    %c0_3 = arith.constant 0 : index
    %4 = vector.load %arg3[%c0_2, %c0_3] : memref<1x128xf32, #tpu.memory_space<vmem>>, vector<1x128xf32>
    %c0_4 = arith.constant 0 : index
    %c0_5 = arith.constant 0 : index
    %5 = vector.load %arg7[%c0_4, %c0_5] : memref<2x128xf32, #tpu.memory_space<vmem>>, vector<2x128xf32>
    %c0_i32_6 = arith.constant 0 : i32
    %6 = arith.index_cast %c0_i32_6 : i32 to index
    %c0_7 = arith.constant 0 : index
    %c0_8 = arith.constant 0 : index
    %7 = vector.load %arg1[%6, %c0_7, %c0_8] : memref<8x2x384xf32, #tpu.memory_space<vmem>>, vector<1x2x384xf32>
    %8 = vector.shape_cast %7 : vector<1x2x384xf32> to vector<2x384xf32>
    %cst = arith.constant dense<0.000000e+00> : vector<2x384xf32>
    %9 = tpu.matmul %5, %3, %cst {dimension_numbers = #tpu.dot_dimension_numbers<[1], [0], [0], [1], [0, 0, 1, 1], [], []>} : vector<2x128xf32>, vector<128x384xf32>, vector<2x384xf32> -> vector<2x384xf32>
    %10 = vector.extract_strided_slice %8 {offsets = [0, 0], sizes = [2, 128], strides = [1, 1]} : vector<2x384xf32> to vector<2x128xf32>
    %11 = vector.extract_strided_slice %9 {offsets = [0, 0], sizes = [2, 128], strides = [1, 1]} : vector<2x384xf32> to vector<2x128xf32>
    %12 = arith.addf %10, %11 : vector<2x128xf32>
    %13 = arith.negf %12 : vector<2x128xf32>
    %14 = math.exp %13 : vector<2x128xf32>
    %cst_9 = arith.constant 1.000000e+00 : f32
    %15 = vector.broadcast %cst_9 : f32 to vector<2x128xf32>
    %16 = arith.addf %15, %14 : vector<2x128xf32>
    %17 = arith.divf %15, %16 : vector<2x128xf32>
    %18 = vector.extract_strided_slice %8 {offsets = [0, 128], sizes = [2, 128], strides = [1, 1]} : vector<2x384xf32> to vector<2x128xf32>
    %19 = vector.extract_strided_slice %9 {offsets = [0, 128], sizes = [2, 128], strides = [1, 1]} : vector<2x384xf32> to vector<2x128xf32>
    %20 = arith.addf %18, %19 : vector<2x128xf32>
    %21 = arith.negf %20 : vector<2x128xf32>
    %22 = math.exp %21 : vector<2x128xf32>
    %cst_10 = arith.constant 1.000000e+00 : f32
    %23 = vector.broadcast %cst_10 : f32 to vector<2x128xf32>
    %24 = arith.addf %23, %22 : vector<2x128xf32>
    %25 = arith.divf %23, %24 : vector<2x128xf32>
    %26 = vector.extract_strided_slice %8 {offsets = [0, 256], sizes = [2, 128], strides = [1, 1]} : vector<2x384xf32> to vector<2x128xf32>
    %27 = vector.extract_strided_slice %9 {offsets = [0, 256], sizes = [2, 128], strides = [1, 1]} : vector<2x384xf32> to vector<2x128xf32>
    %28 = vector.broadcast %4 : vector<1x128xf32> to vector<2x128xf32>
    %29 = arith.addf %27, %28 : vector<2x128xf32>
    %30 = arith.mulf %17, %29 : vector<2x128xf32>
    %31 = arith.addf %26, %30 : vector<2x128xf32>
    %32 = math.tanh %31 : vector<2x128xf32>
    %33 = arith.subf %5, %32 : vector<2x128xf32>
    %34 = arith.mulf %25, %33 : vector<2x128xf32>
    %35 = arith.addf %32, %34 : vector<2x128xf32>
    %c1_i32 = arith.constant 1 : i32
    %36 = arith.index_cast %c1_i32 : i32 to index
    %c0_11 = arith.constant 0 : index
    %c0_12 = arith.constant 0 : index
    %37 = vector.load %arg1[%36, %c0_11, %c0_12] : memref<8x2x384xf32, #tpu.memory_space<vmem>>, vector<1x2x384xf32>
    %38 = vector.shape_cast %37 : vector<1x2x384xf32> to vector<2x384xf32>
    %cst_13 = arith.constant dense<0.000000e+00> : vector<2x384xf32>
    %39 = tpu.matmul %35, %3, %cst_13 {dimension_numbers = #tpu.dot_dimension_numbers<[1], [0], [0], [1], [0, 0, 1, 1], [], []>} : vector<2x128xf32>, vector<128x384xf32>, vector<2x384xf32> -> vector<2x384xf32>
    %40 = vector.extract_strided_slice %38 {offsets = [0, 0], sizes = [2, 128], strides = [1, 1]} : vector<2x384xf32> to vector<2x128xf32>
    %41 = vector.extract_strided_slice %39 {offsets = [0, 0], sizes = [2, 128], strides = [1, 1]} : vector<2x384xf32> to vector<2x128xf32>
    %42 = arith.addf %40, %41 : vector<2x128xf32>
    %43 = arith.negf %42 : vector<2x128xf32>
    %44 = math.exp %43 : vector<2x128xf32>
    %cst_14 = arith.constant 1.000000e+00 : f32
    %45 = vector.broadcast %cst_14 : f32 to vector<2x128xf32>
    %46 = arith.addf %45, %44 : vector<2x128xf32>
    %47 = arith.divf %45, %46 : vector<2x128xf32>
    %48 = vector.extract_strided_slice %38 {offsets = [0, 128], sizes = [2, 128], strides = [1, 1]} : vector<2x384xf32> to vector<2x128xf32>
    %49 = vector.extract_strided_slice %39 {offsets = [0, 128], sizes = [2, 128], strides = [1, 1]} : vector<2x384xf32> to vector<2x128xf32>
    %50 = arith.addf %48, %49 : vector<2x128xf32>
    %51 = arith.negf %50 : vector<2x128xf32>
    %52 = math.exp %51 : vector<2x128xf32>
    %cst_15 = arith.constant 1.000000e+00 : f32
    %53 = vector.broadcast %cst_15 : f32 to vector<2x128xf32>
    %54 = arith.addf %53, %52 : vector<2x128xf32>
    %55 = arith.divf %53, %54 : vector<2x128xf32>
    %56 = vector.extract_strided_slice %38 {offsets = [0, 256], sizes = [2, 128], strides = [1, 1]} : vector<2x384xf32> to vector<2x128xf32>
    %57 = vector.extract_strided_slice %39 {offsets = [0, 256], sizes = [2, 128], strides = [1, 1]} : vector<2x384xf32> to vector<2x128xf32>
    %58 = vector.broadcast %4 : vector<1x128xf32> to vector<2x128xf32>
    %59 = arith.addf %57, %58 : vector<2x128xf32>
    %60 = arith.mulf %47, %59 : vector<2x128xf32>
    %61 = arith.addf %56, %60 : vector<2x128xf32>
    %62 = math.tanh %61 : vector<2x128xf32>
    %63 = arith.subf %35, %62 : vector<2x128xf32>
    %64 = arith.mulf %55, %63 : vector<2x128xf32>
    %65 = arith.addf %62, %64 : vector<2x128xf32>
    %c2_i32 = arith.constant 2 : i32
    %66 = arith.index_cast %c2_i32 : i32 to index
    %c0_16 = arith.constant 0 : index
    %c0_17 = arith.constant 0 : index
    %67 = vector.load %arg1[%66, %c0_16, %c0_17] : memref<8x2x384xf32, #tpu.memory_space<vmem>>, vector<1x2x384xf32>
    %68 = vector.shape_cast %67 : vector<1x2x384xf32> to vector<2x384xf32>
    %cst_18 = arith.constant dense<0.000000e+00> : vector<2x384xf32>
    %69 = tpu.matmul %65, %3, %cst_18 {dimension_numbers = #tpu.dot_dimension_numbers<[1], [0], [0], [1], [0, 0, 1, 1], [], []>} : vector<2x128xf32>, vector<128x384xf32>, vector<2x384xf32> -> vector<2x384xf32>
    %70 = vector.extract_strided_slice %68 {offsets = [0, 0], sizes = [2, 128], strides = [1, 1]} : vector<2x384xf32> to vector<2x128xf32>
    %71 = vector.extract_strided_slice %69 {offsets = [0, 0], sizes = [2, 128], strides = [1, 1]} : vector<2x384xf32> to vector<2x128xf32>
    %72 = arith.addf %70, %71 : vector<2x128xf32>
    %73 = arith.negf %72 : vector<2x128xf32>
    %74 = math.exp %73 : vector<2x128xf32>
    %cst_19 = arith.constant 1.000000e+00 : f32
    %75 = vector.broadcast %cst_19 : f32 to vector<2x128xf32>
    %76 = arith.addf %75, %74 : vector<2x128xf32>
    %77 = arith.divf %75, %76 : vector<2x128xf32>
    %78 = vector.extract_strided_slice %68 {offsets = [0, 128], sizes = [2, 128], strides = [1, 1]} : vector<2x384xf32> to vector<2x128xf32>
    %79 = vector.extract_strided_slice %69 {offsets = [0, 128], sizes = [2, 128], strides = [1, 1]} : vector<2x384xf32> to vector<2x128xf32>
    %80 = arith.addf %78, %79 : vector<2x128xf32>
    %81 = arith.negf %80 : vector<2x128xf32>
    %82 = math.exp %81 : vector<2x128xf32>
    %cst_20 = arith.constant 1.000000e+00 : f32
    %83 = vector.broadcast %cst_20 : f32 to vector<2x128xf32>
    %84 = arith.addf %83, %82 : vector<2x128xf32>
    %85 = arith.divf %83, %84 : vector<2x128xf32>
    %86 = vector.extract_strided_slice %68 {offsets = [0, 256], sizes = [2, 128], strides = [1, 1]} : vector<2x384xf32> to vector<2x128xf32>
    %87 = vector.extract_strided_slice %69 {offsets = [0, 256], sizes = [2, 128], strides = [1, 1]} : vector<2x384xf32> to vector<2x128xf32>
    %88 = vector.broadcast %4 : vector<1x128xf32> to vector<2x128xf32>
    %89 = arith.addf %87, %88 : vector<2x128xf32>
    %90 = arith.mulf %77, %89 : vector<2x128xf32>
    %91 = arith.addf %86, %90 : vector<2x128xf32>
    %92 = math.tanh %91 : vector<2x128xf32>
    %93 = arith.subf %65, %92 : vector<2x128xf32>
    %94 = arith.mulf %85, %93 : vector<2x128xf32>
    %95 = arith.addf %92, %94 : vector<2x128xf32>
    %c3_i32 = arith.constant 3 : i32
    %96 = arith.index_cast %c3_i32 : i32 to index
    %c0_21 = arith.constant 0 : index
    %c0_22 = arith.constant 0 : index
    %97 = vector.load %arg1[%96, %c0_21, %c0_22] : memref<8x2x384xf32, #tpu.memory_space<vmem>>, vector<1x2x384xf32>
    %98 = vector.shape_cast %97 : vector<1x2x384xf32> to vector<2x384xf32>
    %cst_23 = arith.constant dense<0.000000e+00> : vector<2x384xf32>
    %99 = tpu.matmul %95, %3, %cst_23 {dimension_numbers = #tpu.dot_dimension_numbers<[1], [0], [0], [1], [0, 0, 1, 1], [], []>} : vector<2x128xf32>, vector<128x384xf32>, vector<2x384xf32> -> vector<2x384xf32>
    %100 = vector.extract_strided_slice %98 {offsets = [0, 0], sizes = [2, 128], strides = [1, 1]} : vector<2x384xf32> to vector<2x128xf32>
    %101 = vector.extract_strided_slice %99 {offsets = [0, 0], sizes = [2, 128], strides = [1, 1]} : vector<2x384xf32> to vector<2x128xf32>
    %102 = arith.addf %100, %101 : vector<2x128xf32>
    %103 = arith.negf %102 : vector<2x128xf32>
    %104 = math.exp %103 : vector<2x128xf32>
    %cst_24 = arith.constant 1.000000e+00 : f32
    %105 = vector.broadcast %cst_24 : f32 to vector<2x128xf32>
    %106 = arith.addf %105, %104 : vector<2x128xf32>
    %107 = arith.divf %105, %106 : vector<2x128xf32>
    %108 = vector.extract_strided_slice %98 {offsets = [0, 128], sizes = [2, 128], strides = [1, 1]} : vector<2x384xf32> to vector<2x128xf32>
    %109 = vector.extract_strided_slice %99 {offsets = [0, 128], sizes = [2, 128], strides = [1, 1]} : vector<2x384xf32> to vector<2x128xf32>
    %110 = arith.addf %108, %109 : vector<2x128xf32>
    %111 = arith.negf %110 : vector<2x128xf32>
    %112 = math.exp %111 : vector<2x128xf32>
    %cst_25 = arith.constant 1.000000e+00 : f32
    %113 = vector.broadcast %cst_25 : f32 to vector<2x128xf32>
    %114 = arith.addf %113, %112 : vector<2x128xf32>
    %115 = arith.divf %113, %114 : vector<2x128xf32>
    %116 = vector.extract_strided_slice %98 {offsets = [0, 256], sizes = [2, 128], strides = [1, 1]} : vector<2x384xf32> to vector<2x128xf32>
    %117 = vector.extract_strided_slice %99 {offsets = [0, 256], sizes = [2, 128], strides = [1, 1]} : vector<2x384xf32> to vector<2x128xf32>
    %118 = vector.broadcast %4 : vector<1x128xf32> to vector<2x128xf32>
    %119 = arith.addf %117, %118 : vector<2x128xf32>
    %120 = arith.mulf %107, %119 : vector<2x128xf32>
    %121 = arith.addf %116, %120 : vector<2x128xf32>
    %122 = math.tanh %121 : vector<2x128xf32>
    %123 = arith.subf %95, %122 : vector<2x128xf32>
    %124 = arith.mulf %115, %123 : vector<2x128xf32>
    %125 = arith.addf %122, %124 : vector<2x128xf32>
    %c4_i32 = arith.constant 4 : i32
    %126 = arith.index_cast %c4_i32 : i32 to index
    %c0_26 = arith.constant 0 : index
    %c0_27 = arith.constant 0 : index
    %127 = vector.load %arg1[%126, %c0_26, %c0_27] : memref<8x2x384xf32, #tpu.memory_space<vmem>>, vector<1x2x384xf32>
    %128 = vector.shape_cast %127 : vector<1x2x384xf32> to vector<2x384xf32>
    %cst_28 = arith.constant dense<0.000000e+00> : vector<2x384xf32>
    %129 = tpu.matmul %125, %3, %cst_28 {dimension_numbers = #tpu.dot_dimension_numbers<[1], [0], [0], [1], [0, 0, 1, 1], [], []>} : vector<2x128xf32>, vector<128x384xf32>, vector<2x384xf32> -> vector<2x384xf32>
    %130 = vector.extract_strided_slice %128 {offsets = [0, 0], sizes = [2, 128], strides = [1, 1]} : vector<2x384xf32> to vector<2x128xf32>
    %131 = vector.extract_strided_slice %129 {offsets = [0, 0], sizes = [2, 128], strides = [1, 1]} : vector<2x384xf32> to vector<2x128xf32>
    %132 = arith.addf %130, %131 : vector<2x128xf32>
    %133 = arith.negf %132 : vector<2x128xf32>
    %134 = math.exp %133 : vector<2x128xf32>
    %cst_29 = arith.constant 1.000000e+00 : f32
    %135 = vector.broadcast %cst_29 : f32 to vector<2x128xf32>
    %136 = arith.addf %135, %134 : vector<2x128xf32>
    %137 = arith.divf %135, %136 : vector<2x128xf32>
    %138 = vector.extract_strided_slice %128 {offsets = [0, 128], sizes = [2, 128], strides = [1, 1]} : vector<2x384xf32> to vector<2x128xf32>
    %139 = vector.extract_strided_slice %129 {offsets = [0, 128], sizes = [2, 128], strides = [1, 1]} : vector<2x384xf32> to vector<2x128xf32>
    %140 = arith.addf %138, %139 : vector<2x128xf32>
    %141 = arith.negf %140 : vector<2x128xf32>
    %142 = math.exp %141 : vector<2x128xf32>
    %cst_30 = arith.constant 1.000000e+00 : f32
    %143 = vector.broadcast %cst_30 : f32 to vector<2x128xf32>
    %144 = arith.addf %143, %142 : vector<2x128xf32>
    %145 = arith.divf %143, %144 : vector<2x128xf32>
    %146 = vector.extract_strided_slice %128 {offsets = [0, 256], sizes = [2, 128], strides = [1, 1]} : vector<2x384xf32> to vector<2x128xf32>
    %147 = vector.extract_strided_slice %129 {offsets = [0, 256], sizes = [2, 128], strides = [1, 1]} : vector<2x384xf32> to vector<2x128xf32>
    %148 = vector.broadcast %4 : vector<1x128xf32> to vector<2x128xf32>
    %149 = arith.addf %147, %148 : vector<2x128xf32>
    %150 = arith.mulf %137, %149 : vector<2x128xf32>
    %151 = arith.addf %146, %150 : vector<2x128xf32>
    %152 = math.tanh %151 : vector<2x128xf32>
    %153 = arith.subf %125, %152 : vector<2x128xf32>
    %154 = arith.mulf %145, %153 : vector<2x128xf32>
    %155 = arith.addf %152, %154 : vector<2x128xf32>
    %c5_i32 = arith.constant 5 : i32
    %156 = arith.index_cast %c5_i32 : i32 to index
    %c0_31 = arith.constant 0 : index
    %c0_32 = arith.constant 0 : index
    %157 = vector.load %arg1[%156, %c0_31, %c0_32] : memref<8x2x384xf32, #tpu.memory_space<vmem>>, vector<1x2x384xf32>
    %158 = vector.shape_cast %157 : vector<1x2x384xf32> to vector<2x384xf32>
    %cst_33 = arith.constant dense<0.000000e+00> : vector<2x384xf32>
    %159 = tpu.matmul %155, %3, %cst_33 {dimension_numbers = #tpu.dot_dimension_numbers<[1], [0], [0], [1], [0, 0, 1, 1], [], []>} : vector<2x128xf32>, vector<128x384xf32>, vector<2x384xf32> -> vector<2x384xf32>
    %160 = vector.extract_strided_slice %158 {offsets = [0, 0], sizes = [2, 128], strides = [1, 1]} : vector<2x384xf32> to vector<2x128xf32>
    %161 = vector.extract_strided_slice %159 {offsets = [0, 0], sizes = [2, 128], strides = [1, 1]} : vector<2x384xf32> to vector<2x128xf32>
    %162 = arith.addf %160, %161 : vector<2x128xf32>
    %163 = arith.negf %162 : vector<2x128xf32>
    %164 = math.exp %163 : vector<2x128xf32>
    %cst_34 = arith.constant 1.000000e+00 : f32
    %165 = vector.broadcast %cst_34 : f32 to vector<2x128xf32>
    %166 = arith.addf %165, %164 : vector<2x128xf32>
    %167 = arith.divf %165, %166 : vector<2x128xf32>
    %168 = vector.extract_strided_slice %158 {offsets = [0, 128], sizes = [2, 128], strides = [1, 1]} : vector<2x384xf32> to vector<2x128xf32>
    %169 = vector.extract_strided_slice %159 {offsets = [0, 128], sizes = [2, 128], strides = [1, 1]} : vector<2x384xf32> to vector<2x128xf32>
    %170 = arith.addf %168, %169 : vector<2x128xf32>
    %171 = arith.negf %170 : vector<2x128xf32>
    %172 = math.exp %171 : vector<2x128xf32>
    %cst_35 = arith.constant 1.000000e+00 : f32
    %173 = vector.broadcast %cst_35 : f32 to vector<2x128xf32>
    %174 = arith.addf %173, %172 : vector<2x128xf32>
    %175 = arith.divf %173, %174 : vector<2x128xf32>
    %176 = vector.extract_strided_slice %158 {offsets = [0, 256], sizes = [2, 128], strides = [1, 1]} : vector<2x384xf32> to vector<2x128xf32>
    %177 = vector.extract_strided_slice %159 {offsets = [0, 256], sizes = [2, 128], strides = [1, 1]} : vector<2x384xf32> to vector<2x128xf32>
    %178 = vector.broadcast %4 : vector<1x128xf32> to vector<2x128xf32>
    %179 = arith.addf %177, %178 : vector<2x128xf32>
    %180 = arith.mulf %167, %179 : vector<2x128xf32>
    %181 = arith.addf %176, %180 : vector<2x128xf32>
    %182 = math.tanh %181 : vector<2x128xf32>
    %183 = arith.subf %155, %182 : vector<2x128xf32>
    %184 = arith.mulf %175, %183 : vector<2x128xf32>
    %185 = arith.addf %182, %184 : vector<2x128xf32>
    %c6_i32 = arith.constant 6 : i32
    %186 = arith.index_cast %c6_i32 : i32 to index
    %c0_36 = arith.constant 0 : index
    %c0_37 = arith.constant 0 : index
    %187 = vector.load %arg1[%186, %c0_36, %c0_37] : memref<8x2x384xf32, #tpu.memory_space<vmem>>, vector<1x2x384xf32>
    %188 = vector.shape_cast %187 : vector<1x2x384xf32> to vector<2x384xf32>
    %cst_38 = arith.constant dense<0.000000e+00> : vector<2x384xf32>
    %189 = tpu.matmul %185, %3, %cst_38 {dimension_numbers = #tpu.dot_dimension_numbers<[1], [0], [0], [1], [0, 0, 1, 1], [], []>} : vector<2x128xf32>, vector<128x384xf32>, vector<2x384xf32> -> vector<2x384xf32>
    %190 = vector.extract_strided_slice %188 {offsets = [0, 0], sizes = [2, 128], strides = [1, 1]} : vector<2x384xf32> to vector<2x128xf32>
    %191 = vector.extract_strided_slice %189 {offsets = [0, 0], sizes = [2, 128], strides = [1, 1]} : vector<2x384xf32> to vector<2x128xf32>
    %192 = arith.addf %190, %191 : vector<2x128xf32>
    %193 = arith.negf %192 : vector<2x128xf32>
    %194 = math.exp %193 : vector<2x128xf32>
    %cst_39 = arith.constant 1.000000e+00 : f32
    %195 = vector.broadcast %cst_39 : f32 to vector<2x128xf32>
    %196 = arith.addf %195, %194 : vector<2x128xf32>
    %197 = arith.divf %195, %196 : vector<2x128xf32>
    %198 = vector.extract_strided_slice %188 {offsets = [0, 128], sizes = [2, 128], strides = [1, 1]} : vector<2x384xf32> to vector<2x128xf32>
    %199 = vector.extract_strided_slice %189 {offsets = [0, 128], sizes = [2, 128], strides = [1, 1]} : vector<2x384xf32> to vector<2x128xf32>
    %200 = arith.addf %198, %199 : vector<2x128xf32>
    %201 = arith.negf %200 : vector<2x128xf32>
    %202 = math.exp %201 : vector<2x128xf32>
    %cst_40 = arith.constant 1.000000e+00 : f32
    %203 = vector.broadcast %cst_40 : f32 to vector<2x128xf32>
    %204 = arith.addf %203, %202 : vector<2x128xf32>
    %205 = arith.divf %203, %204 : vector<2x128xf32>
    %206 = vector.extract_strided_slice %188 {offsets = [0, 256], sizes = [2, 128], strides = [1, 1]} : vector<2x384xf32> to vector<2x128xf32>
    %207 = vector.extract_strided_slice %189 {offsets = [0, 256], sizes = [2, 128], strides = [1, 1]} : vector<2x384xf32> to vector<2x128xf32>
    %208 = vector.broadcast %4 : vector<1x128xf32> to vector<2x128xf32>
    %209 = arith.addf %207, %208 : vector<2x128xf32>
    %210 = arith.mulf %197, %209 : vector<2x128xf32>
    %211 = arith.addf %206, %210 : vector<2x128xf32>
    %212 = math.tanh %211 : vector<2x128xf32>
    %213 = arith.subf %185, %212 : vector<2x128xf32>
    %214 = arith.mulf %205, %213 : vector<2x128xf32>
    %215 = arith.addf %212, %214 : vector<2x128xf32>
    %c7_i32 = arith.constant 7 : i32
    %216 = arith.index_cast %c7_i32 : i32 to index
    %c0_41 = arith.constant 0 : index
    %c0_42 = arith.constant 0 : index
    %217 = vector.load %arg1[%216, %c0_41, %c0_42] : memref<8x2x384xf32, #tpu.memory_space<vmem>>, vector<1x2x384xf32>
    %218 = vector.shape_cast %217 : vector<1x2x384xf32> to vector<2x384xf32>
    %cst_43 = arith.constant dense<0.000000e+00> : vector<2x384xf32>
    %219 = tpu.matmul %215, %3, %cst_43 {dimension_numbers = #tpu.dot_dimension_numbers<[1], [0], [0], [1], [0, 0, 1, 1], [], []>} : vector<2x128xf32>, vector<128x384xf32>, vector<2x384xf32> -> vector<2x384xf32>
    %220 = vector.extract_strided_slice %218 {offsets = [0, 0], sizes = [2, 128], strides = [1, 1]} : vector<2x384xf32> to vector<2x128xf32>
    %221 = vector.extract_strided_slice %219 {offsets = [0, 0], sizes = [2, 128], strides = [1, 1]} : vector<2x384xf32> to vector<2x128xf32>
    %222 = arith.addf %220, %221 : vector<2x128xf32>
    %223 = arith.negf %222 : vector<2x128xf32>
    %224 = math.exp %223 : vector<2x128xf32>
    %cst_44 = arith.constant 1.000000e+00 : f32
    %225 = vector.broadcast %cst_44 : f32 to vector<2x128xf32>
    %226 = arith.addf %225, %224 : vector<2x128xf32>
    %227 = arith.divf %225, %226 : vector<2x128xf32>
    %228 = vector.extract_strided_slice %218 {offsets = [0, 128], sizes = [2, 128], strides = [1, 1]} : vector<2x384xf32> to vector<2x128xf32>
    %229 = vector.extract_strided_slice %219 {offsets = [0, 128], sizes = [2, 128], strides = [1, 1]} : vector<2x384xf32> to vector<2x128xf32>
    %230 = arith.addf %228, %229 : vector<2x128xf32>
    %231 = arith.negf %230 : vector<2x128xf32>
    %232 = math.exp %231 : vector<2x128xf32>
    %cst_45 = arith.constant 1.000000e+00 : f32
    %233 = vector.broadcast %cst_45 : f32 to vector<2x128xf32>
    %234 = arith.addf %233, %232 : vector<2x128xf32>
    %235 = arith.divf %233, %234 : vector<2x128xf32>
    %236 = vector.extract_strided_slice %218 {offsets = [0, 256], sizes = [2, 128], strides = [1, 1]} : vector<2x384xf32> to vector<2x128xf32>
    %237 = vector.extract_strided_slice %219 {offsets = [0, 256], sizes = [2, 128], strides = [1, 1]} : vector<2x384xf32> to vector<2x128xf32>
    %238 = vector.broadcast %4 : vector<1x128xf32> to vector<2x128xf32>
    %239 = arith.addf %237, %238 : vector<2x128xf32>
    %240 = arith.mulf %227, %239 : vector<2x128xf32>
    %241 = arith.addf %236, %240 : vector<2x128xf32>
    %242 = math.tanh %241 : vector<2x128xf32>
    %243 = arith.subf %215, %242 : vector<2x128xf32>
    %244 = arith.mulf %235, %243 : vector<2x128xf32>
    %245 = arith.addf %242, %244 : vector<2x128xf32>
    %c8_i32 = arith.constant 8 : i32
    %c0_46 = arith.constant 0 : index
    %c0_47 = arith.constant 0 : index
    %246 = vector.load %arg7[%c0_46, %c0_47] : memref<2x128xf32, #tpu.memory_space<vmem>>, vector<2x128xf32>
    tpu.vector_store %arg7[%c0_46, %c0_47], %245 {strides = array<i32>} : memref<2x128xf32, #tpu.memory_space<vmem>>, vector<2x128xf32>,
    %c0_i32_48 = arith.constant 0 : i32
    %247 = arith.cmpi eq, %arg0, %c0_i32_48 : i32
    %248 = arith.extui %247 : i1 to i32
    %c0_i32_49 = arith.constant 0 : i32
    %249 = arith.cmpi ne, %248, %c0_i32_49 : i32
    scf.if %249 {
      %c0_50 = arith.constant 0 : index
      %c0_51 = arith.constant 0 : index
      %250 = vector.load %arg4[%c0_50, %c0_51] : memref<128x32xf32, #tpu.memory_space<vmem>>, vector<128x32xf32>
      %cst_52 = arith.constant dense<0.000000e+00> : vector<2x32xf32>
      %251 = tpu.matmul %245, %250, %cst_52 {dimension_numbers = #tpu.dot_dimension_numbers<[1], [0], [0], [1], [0, 0, 1, 1], [], []>} : vector<2x128xf32>, vector<128x32xf32>, vector<2x32xf32> -> vector<2x32xf32>
      %c0_53 = arith.constant 0 : index
      %c0_54 = arith.constant 0 : index
      %252 = vector.load %arg5[%c0_53, %c0_54] : memref<1x32xf32, #tpu.memory_space<vmem>>, vector<1x32xf32>
      %253 = vector.broadcast %252 : vector<1x32xf32> to vector<2x32xf32>
      %254 = arith.addf %251, %253 : vector<2x32xf32>
      %c0_55 = arith.constant 0 : index
      %c0_56 = arith.constant 0 : index
      %255 = vector.load %arg6[%c0_55, %c0_56] : memref<2x32xf32, #tpu.memory_space<vmem>>, vector<2x32xf32>
      tpu.vector_store %arg6[%c0_55, %c0_56], %254 {strides = array<i32>} : memref<2x32xf32, #tpu.memory_space<vmem>>, vector<2x32xf32>,
    } else {
    }
    return
  }
  func.func @transform_0(%arg0: i32) -> (i32, i32, i32) {
    %c0_i32 = arith.constant 0 : i32
    %c0_i32_0 = arith.constant 0 : i32
    %c0_i32_1 = arith.constant 0 : i32
    return %arg0, %c0_i32, %c0_i32_0 : i32, i32, i32
  }
  func.func @transform_1(%arg0: i32) -> (i32, i32) {
    %c0_i32 = arith.constant 0 : i32
    %c0_i32_0 = arith.constant 0 : i32
    %c0_i32_1 = arith.constant 0 : i32
    return %c0_i32, %c0_i32_0 : i32, i32
  }
  func.func @transform_2(%arg0: i32) -> (i32, i32) {
    %c0_i32 = arith.constant 0 : i32
    %c0_i32_0 = arith.constant 0 : i32
    %c0_i32_1 = arith.constant 0 : i32
    return %c0_i32, %c0_i32_0 : i32, i32
  }
  func.func @transform_3(%arg0: i32) -> (i32, i32) {
    %c0_i32 = arith.constant 0 : i32
    %c0_i32_0 = arith.constant 0 : i32
    %c0_i32_1 = arith.constant 0 : i32
    return %c0_i32, %c0_i32_0 : i32, i32
  }
  func.func @transform_4(%arg0: i32) -> (i32, i32) {
    %c0_i32 = arith.constant 0 : i32
    %c0_i32_0 = arith.constant 0 : i32
    %c0_i32_1 = arith.constant 0 : i32
    return %c0_i32, %c0_i32_0 : i32, i32
  }
  func.func @transform_5(%arg0: i32) -> (i32, i32) {
    %c0_i32 = arith.constant 0 : i32
    %c0_i32_0 = arith.constant 0 : i32
    %c0_i32_1 = arith.constant 0 : i32
    return %c0_i32, %c0_i32_0 : i32, i32
  }
}

</mosaic_0001>

<bundles_post_ra>
// kernel: tpu_custom_call.1
= control target key start
LH: loop header
LB: loop body
LE: loop exit
PB: predicated region body
PF: predicated region fallthrough
CT: control target
= control target key end

     0   :  { %10 = vsyncpa [#allocation4], 0  ;;  %s3155_s0 = inlined_call_operand.vmem [shape: f32[8,2,384], index: 0, kind: input, shape index: {}]   ;;  %s3156_s1 = inlined_call_operand.hbm [shape: f32[128,384], index: 1, kind: input, shape index: {}]   ;;  %s3157_s2 = inlined_call_operand.vmem [shape: f32[1,128], index: 2, kind: input, shape index: {}]   ;;  %s3158_s3 = inlined_call_operand.vmem [shape: f32[128,32], index: 3, kind: input, shape index: {}]   ;;  %s3159_s4 = inlined_call_operand.vmem [shape: f32[1,32], index: 4, kind: input, shape index: {}]   ;;  %s3160_s5 = inlined_call_operand.hbm [shape: f32[2,32], index: 5, kind: output, shape index: {}]  }
   0x1   :  { %11 = vsyncpa [#allocation5], 0  ;;  %s2233_s18 = smov [#allocation3]  }
   0x2   :  { %s19_s19 = sshll.u32 %s2233_s18, 4  ;;  %s20_s19 = int_to_ptr.vmem [resolvable:$true] %s19_s19 }
   0x3   :  { %s2197_s20 = scalar_lea.vmem %s20_s19, 6144  ;;  %p2202_p1 = scmp.lt.s32.totalorder %s20_s19, %s20_s19 }
   0x4   :  { %p2198_p0 = scmp.ne.s32.totalorder %s20_s19, %s2197_s20  ;;  %p2203_p2 = scmp.lt.s32.totalorder %s2197_s20, %s2197_s20 }
   0x6   :  { %p2204_p3 = por %p2203_p2, %p2202_p1 }
   0x8   :  { %p2205_p4 = pnand %p2204_p3, %p2198_p0 }
   0xa   :  { %2208 = shalt.err (!%p2205_p4)
}
   0xb   :  { %s2234_s21 = smov 384   ;;  %s2235_s22 = smov 24  }
   0xc   :  { %25 = dma.hbm_to_vmem [thread:$0]  %s3156_s1, 6144, %s20_s19, [#allocation4], %s2234_s21, %s2234_s21, %s2235_s22  }
   0xd   :  { %2229 = dma.done.wait [#allocation4], 6144  }
   0xe   :  { %2230 = vsyncadd [#allocation4], 4294961152  ;;  %v3161_v0 = vmov 0.0   ;;  %vm2237_vm0 = vmmov 0   ;;  %v2277_v1 = vld [vmem:[#allocation3 + $0x170] sm:$0xff]  ;;  %v2279_v2 = vld [vmem:[#allocation3 + $0x168] sm:$0xff] }
   0xf   :  { %1739 = vmatprep.subr.mxu1 %v3161_v0  ;;  %39 = vst [vmem:[#allocation2] sm:$0x3] %v3161_v0  ;;  %155 = vmatprep.mubr.f32.mxu0 %v3161_v0  ;;  %3180 = vst [vmem:[#allocation9_spill] sm:$0xff] %v2277_v1  ;;  %v2281_v3 = vld [vmem:[#allocation3 + $0x158] sm:$0xff]  ;;  %v2284_v4 = vld [vmem:[#allocation3 + $0x150] sm:$0xff]  ;;  %s2238_s23 = smov [#allocation6]  }
  0x10   :  { %1771 = vmatprep.mubr.msk.f32.mxu1 %vm2237_vm0, %v3161_v0  ;;  %91 = vmatprep.subr.mxu0 %v2277_v1  ;;  %v2287_v5 = vld [vmem:[#allocation3 + $0x140] sm:$0xff]  ;;  %v2290_v6 = vld [vmem:[#allocation3 + $0x138] sm:$0xff]  ;;  %v2293_v7 = vld [vmem:[#allocation3 + $0x128] sm:$0xff]  ;;  %s1552_s24 = sshll.u32 %s2238_s23, 4  ;;  %vm1544_vm1 = vcmask 254976   ;;  %s1553_s24 = int_to_ptr.vmem [resolvable:$true] %s1552_s24 }
  0x11   :  { %92 = vmatpush1.msra.mxu0 %v2279_v2  ;;  %v2296_v8 = vld [vmem:[#allocation3 + $0x120] sm:$0xff]  ;;  %v2299_v9 = vld [vmem:[#allocation3 + $0x110] sm:$0xff]  ;;  %v2302_v10 = vld [vmem:[#allocation3 + $0x108] sm:$0xff]  ;;  %s2209_s1 = scalar_lea.vmem %s1553_s24, 32  ;;  %p2214_p6 = scmp.lt.s32.totalorder %s1553_s24, %s1553_s24 }
  0x12   :  { %93 = vmatprep.subr.mxu0 %v2281_v3  ;;  %v2305_v11 = vld [vmem:[#allocation3 + $0xf8] sm:$0xff]  ;;  %v2308_v12 = vld [vmem:[#allocation3 + $0xf0] sm:$0xff]  ;;  %v2311_v13 = vld [vmem:[#allocation3 + $0xe0] sm:$0xff]  ;;  %p2210_p5 = scmp.ne.s32.totalorder %s1553_s24, %s2209_s1  ;;  %p2215_p7 = scmp.lt.s32.totalorder %s2209_s1, %s2209_s1 }
  0x13   :  { %94 = vmatpush1.msra.mxu0 %v2284_v4  ;;  %v2313_v14 = vld [vmem:[#allocation3 + $0x178] sm:$0xff]  ;;  %v2319_v16 = vld [vmem:[#allocation3 + $0x160] sm:$0xff]  ;;  %v2322_v17 = vld [vmem:[#allocation3 + $0xc8] sm:$0xff] }
  0x14   :  { %95 = vmatprep.subr.mxu0 %v2287_v5  ;;  %v2316_v15 = vld [vmem:[#allocation3 + $0xd8] sm:$0xff]  ;;  %1740 = vmatpush3.msra.mxu1 %v2313_v14  ;;  %v2325_v18 = vld [vmem:[#allocation3 + $0x148] sm:$0xff]  ;;  %v2328_v19 = vld [vmem:[#allocation3 + $0xc0] sm:$0xff]  ;;  %p2216_p8 = por %p2215_p7, %p2214_p6 }
  0x15   :  { %96 = vmatpush1.msra.mxu0 %v2290_v6  ;;  %1741 = vmatprep.subr.mxu1 %v3161_v0  ;;  %v2332_v20 = vld [vmem:[#allocation3 + $0xb0] sm:$0xff]  ;;  %v2338_v22 = vld [vmem:[#allocation3 + $0xa8] sm:$0xff]  ;;  %v2342_v23 = vld [vmem:[#allocation3 + $0x98] sm:$0xff] }
  0x16   :  { %97 = vmatprep.subr.mxu0 %v2293_v7  ;;  %1742 = vmatpush3.msra.mxu1 %v2319_v16  ;;  %v2335_v21 = vld [vmem:[#allocation3 + $0x130] sm:$0xff]  ;;  %v2345_v24 = vld [vmem:[#allocation3 + $0x118] sm:$0xff]  ;;  %v2352_v26 = vld [vmem:[#allocation3 + $0x80] sm:$0xff]  ;;  %p2217_p9 = pnand %p2216_p8, %p2210_p5 }
  0x17   :  { %98 = vmatpush1.msra.mxu0 %v2296_v8  ;;  %1743 = vmatprep.subr.mxu1 %v3161_v0  ;;  %v2348_v25 = vld [vmem:[#allocation3 + $0x90] sm:$0xff]  ;;  %v2355_v27 = vld [vmem:[#allocation3 + $0x100] sm:$0xff]  ;;  %v2358_v28 = vld [vmem:[#allocation3 + $0x78] sm:$0xff] }
  0x18   :  { %99 = vmatprep.subr.mxu0 %v2299_v9  ;;  %1744 = vmatpush3.msra.mxu1 %v2325_v18  ;;  %v2362_v29 = vld [vmem:[#allocation3 + $0x68] sm:$0xff]  ;;  %v2368_v31 = vld [vmem:[#allocation3 + $0x60] sm:$0xff]  ;;  %v2372_v32 = vld [vmem:[#allocation3 + $0x50] sm:$0xff] }
  0x19   :  { %100 = vmatpush1.msra.mxu0 %v2302_v10  ;;  %1745 = vmatprep.subr.mxu1 %v3161_v0  ;;  %v2365_v30 = vld [vmem:[#allocation3 + $0xe8] sm:$0xff]  ;;  %v2375_v33 = vld [vmem:[#allocation3 + $0xd0] sm:$0xff]  ;;  %v2382_v35 = vld [vmem:[#allocation3 + $0x38] sm:$0xff] }
  0x1a   :  { %101 = vmatprep.subr.mxu0 %v2305_v11  ;;  %1746 = vmatpush3.msra.mxu1 %v2335_v21  ;;  %v2378_v34 = vld [vmem:[#allocation3 + $0x48] sm:$0xff]  ;;  %v2385_v36 = vld [vmem:[#allocation3 + $0xb8] sm:$0xff]  ;;  %v2388_v37 = vld [vmem:[#allocation3 + $0x30] sm:$0xff] }
  0x1b   :  { %102 = vmatpush1.msra.mxu0 %v2308_v12  ;;  %1747 = vmatprep.subr.mxu1 %v3161_v0  ;;  %v2392_v38 = vld [vmem:[#allocation3 + $0x20] sm:$0xff]  ;;  %v2398_v40 = vld [vmem:[#allocation3 + $0x18] sm:$0xff]  ;;  %v2402_v41 = vld [vmem:[#allocation3 + $0x8] sm:$0xff] }
  0x1c   :  { %103 = vmatprep.subr.mxu0 %v2311_v13  ;;  %1748 = vmatpush3.msra.mxu1 %v2345_v24  ;;  %v2395_v39 = vld [vmem:[#allocation3 + $0xa0] sm:$0xff]  ;;  %3181 = vst [vmem:[#allocation10_spill] sm:$0xff] %v2398_v40  ;;  %3182 = vst [vmem:[#allocation11_spill] sm:$0xff] %v2402_v41  ;;  %v2405_v42 = vld [vmem:[#allocation3 + $0x88] sm:$0xff] }
  0x1d   :  { %104 = vmatpush1.msra.mxu0 %v2316_v15  ;;  %1749 = vmatprep.subr.mxu1 %v3161_v0  ;;  %v2408_v43 = vld [vmem:[#allocation3] sm:$0xff]  ;;  %v2412_v44 = vld [vmem:[#allocation2] sm:$0x3]  ;;  %v2415_v45 = vld [vmem:[#allocation3 + $0x70] sm:$0xff] }
  0x1e   :  { %105 = vmatprep.subr.mxu0 %v2322_v17  ;;  %1750 = vmatpush3.msra.mxu1 %v2355_v27  ;;  %3183 = vst [vmem:[#allocation12_spill] sm:$0xff] %v2408_v43  ;;  %v2421_v46 = vld [vmem:[#allocation3 + $0x58] sm:$0xff]  ;;  %v2426_v47 = vld [vmem:[#allocation3 + $0x40] sm:$0xff]  ;;  %v2432_v48 = vld [vmem:[#allocation3 + $0x28] sm:$0xff] }
  0x1f   :  { %106 = vmatpush1.msra.mxu0 %v2328_v19  ;;  %1751 = vmatprep.subr.mxu1 %v3161_v0  ;;  %3184 = vst [vmem:[#allocation13_spill] sm:$0xff] %v2432_v48  ;;  %v2438_v49 = vld [vmem:[#allocation3 + $0x10] sm:$0xff]  ;;  %v90_v50 = vld [vmem:[%s3155_s0] sm:$0x3f] }
  0x20   :  { %107 = vmatprep.subr.mxu0 %v2332_v20  ;;  %1752 = vmatpush3.msra.mxu1 %v2365_v30  ;;  %3185 = vst [vmem:[#allocation14_spill] sm:$0xff] %v2438_v49  ;;  %v240_v54 = vrot.slane %v90_v50, 2  ;;  %v2515_v62 = vld [vmem:[%s3157_s2] ss:$0 sm:$0xff] }
  0x21   :  { %108 = vmatpush1.msra.mxu0 %v2338_v22  ;;  %1753 = vmatprep.subr.mxu1 %v3161_v0 }
  0x22   :  { %109 = vmatprep.subr.mxu0 %v2342_v23  ;;  %1754 = vmatpush3.msra.mxu1 %v2375_v33 }
  0x23   :  { %110 = vmatpush1.msra.mxu0 %v2348_v25  ;;  %1755 = vmatprep.subr.mxu1 %v3161_v0 }
  0x24   :  { %111 = vmatprep.subr.mxu0 %v2352_v26  ;;  %1756 = vmatpush3.msra.mxu1 %v2385_v36 }
  0x25   :  { %112 = vmatpush1.msra.mxu0 %v2358_v28  ;;  %1757 = vmatprep.subr.mxu1 %v3161_v0 }
  0x26   :  { %113 = vmatprep.subr.mxu0 %v2362_v29  ;;  %1758 = vmatpush3.msra.mxu1 %v2395_v39 }
  0x27   :  { %114 = vmatpush1.msra.mxu0 %v2368_v31  ;;  %1759 = vmatprep.subr.mxu1 %v3161_v0 }
  0x28   :  { %115 = vmatprep.subr.mxu0 %v2372_v32  ;;  %1760 = vmatpush3.msra.mxu1 %v2405_v42 }
  0x29   :  { %116 = vmatpush1.msra.mxu0 %v2378_v34  ;;  %1761 = vmatprep.subr.mxu1 %v3161_v0 }
  0x2a   :  { %117 = vmatprep.subr.mxu0 %v2382_v35  ;;  %1762 = vmatpush3.msra.mxu1 %v2415_v45 }
  0x2b   :  { %118 = vmatpush1.msra.mxu0 %v2388_v37  ;;  %1763 = vmatprep.subr.mxu1 %v3161_v0 }
  0x2c   :  { %119 = vmatprep.subr.mxu0 %v2392_v38  ;;  %1764 = vmatpush3.msra.mxu1 %v2421_v46 }
  0x2d   :  { %120 = vmatpush1.msra.mxu0 %v2398_v40  ;;  %1765 = vmatprep.subr.mxu1 %v3161_v0 }
  0x2e   :  { %121 = vmatprep.subr.mxu0 %v2402_v41  ;;  %1766 = vmatpush3.msra.mxu1 %v2426_v47 }
  0x2f   :  { %122 = vmatpush1.msra.mxu0 %v2408_v43  ;;  %1767 = vmatprep.subr.mxu1 %v3161_v0 }
  0x30   :  { %156 = vmatmul.mubr.f32.vlgmr.msra.gmra.mxu0 %v2412_v44  ;;  %266 = vmatprep.subr.mxu0 %v2277_v1 }
  0x31   :  { %267 = vmatpush1.msra.mxu0 %v2279_v2  ;;  %1768 = vmatpush3.msra.mxu1 %v2432_v48 }
  0x32   :  { %268 = vmatprep.subr.mxu0 %v2281_v3  ;;  %1769 = vmatprep.subr.mxu1 %v3161_v0 }
  0x33   :  { %269 = vmatpush1.msra.mxu0 %v2284_v4  ;;  %1770 = vmatpush3.msra.mxu1 %v2438_v49 }
  0x34   :  { %270 = vmatprep.subr.mxu0 %v2287_v5  ;;  %1772 = vmatmul.mubr.f32.vlgmr.msra.gmra.mxu1 %v2412_v44 }
  0x35   :  { %271 = vmatpush1.msra.mxu0 %v2290_v6  ;;  %1774 = vmatprep.subr.mxu1 %v3161_v0 }
  0x36   :  { %272 = vmatprep.subr.mxu0 %v2293_v7  ;;  %1775 = vmatpush3.msra.mxu1 %v2313_v14 }
  0x37   :  { %273 = vmatpush1.msra.mxu0 %v2296_v8  ;;  %1776 = vmatprep.subr.mxu1 %v3161_v0 }
  0x38   :  { %274 = vmatprep.subr.mxu0 %v2299_v9  ;;  %1777 = vmatpush3.msra.mxu1 %v2319_v16 }
  0x39   :  { %275 = vmatpush1.msra.mxu0 %v2302_v10  ;;  %1778 = vmatprep.subr.mxu1 %v3161_v0 }
  0x3a   :  { %276 = vmatprep.subr.mxu0 %v2305_v11  ;;  %1779 = vmatpush3.msra.mxu1 %v2325_v18 }
  0x3b   :  { %277 = vmatpush1.msra.mxu0 %v2308_v12  ;;  %1780 = vmatprep.subr.mxu1 %v3161_v0 }
  0x3c   :  { %278 = vmatprep.subr.mxu0 %v2311_v13  ;;  %1781 = vmatpush3.msra.mxu1 %v2335_v21 }
  0x3d   :  { %279 = vmatpush1.msra.mxu0 %v2316_v15  ;;  %1782 = vmatprep.subr.mxu1 %v3161_v0 }
  0x3e   :  { %280 = vmatprep.subr.mxu0 %v2322_v17  ;;  %1783 = vmatpush3.msra.mxu1 %v2345_v24 }
  0x3f   :  { %281 = vmatpush1.msra.mxu0 %v2328_v19  ;;  %1784 = vmatprep.subr.mxu1 %v3161_v0 }
  0x40   :  { %282 = vmatprep.subr.mxu0 %v2332_v20  ;;  %1785 = vmatpush3.msra.mxu1 %v2355_v27 }
  0x41   :  { %283 = vmatpush1.msra.mxu0 %v2338_v22  ;;  %1786 = vmatprep.subr.mxu1 %v3161_v0 }
  0x42   :  { %284 = vmatprep.subr.mxu0 %v2342_v23  ;;  %1787 = vmatpush3.msra.mxu1 %v2365_v30 }
  0x43   :  { %285 = vmatpush1.msra.mxu0 %v2348_v25  ;;  %1788 = vmatprep.subr.mxu1 %v3161_v0 }
  0x44   :  { %286 = vmatprep.subr.mxu0 %v2352_v26  ;;  %1789 = vmatpush3.msra.mxu1 %v2375_v33 }
  0x45   :  { %287 = vmatpush1.msra.mxu0 %v2358_v28  ;;  %1790 = vmatprep.subr.mxu1 %v3161_v0 }
  0x46   :  { %288 = vmatprep.subr.mxu0 %v2362_v29  ;;  %1791 = vmatpush3.msra.mxu1 %v2385_v36 }
  0x47   :  { %289 = vmatpush1.msra.mxu0 %v2368_v31  ;;  %1792 = vmatprep.subr.mxu1 %v3161_v0 }
  0x48   :  { %290 = vmatprep.subr.mxu0 %v2372_v32  ;;  %1793 = vmatpush3.msra.mxu1 %v2395_v39 }
  0x49   :  { %291 = vmatpush1.msra.mxu0 %v2378_v34  ;;  %1794 = vmatprep.subr.mxu1 %v3161_v0 }
  0x4a   :  { %292 = vmatprep.subr.mxu0 %v2382_v35  ;;  %1795 = vmatpush3.msra.mxu1 %v2405_v42 }
  0x4b   :  { %293 = vmatpush1.msra.mxu0 %v2388_v37  ;;  %1796 = vmatprep.subr.mxu1 %v3161_v0 }
  0x4c   :  { %294 = vmatprep.subr.mxu0 %v2392_v38  ;;  %1797 = vmatpush3.msra.mxu1 %v2415_v45 }
  0x4d   :  { %295 = vmatpush1.msra.mxu0 %v2398_v40  ;;  %1798 = vmatprep.subr.mxu1 %v3161_v0 }
  0x4e   :  { %296 = vmatprep.subr.mxu0 %v2402_v41  ;;  %1799 = vmatpush3.msra.mxu1 %v2421_v46 }
  0x4f   :  { %297 = vmatpush1.msra.mxu0 %v2408_v43  ;;  %330 = vmatprep.mubr.f32.mxu0 %v3161_v0 }
  0x50   :  { %1800 = vmatprep.subr.mxu1 %v3161_v0  ;;  %1806 = vmatprep.mubr.msk.f32.mxu1 %vm2237_vm0, %v3161_v0 }
  0x51   :  { %1801 = vmatpush3.msra.mxu1 %v2426_v47  ;;  %435 = vmatprep.subr.mxu0 %v2277_v1 }
  0x52   :  { %1802 = vmatprep.subr.mxu1 %v3161_v0 }
  0x53   :  { %1803 = vmatpush3.msra.mxu1 %v2432_v48 }
  0x54   :  { %1804 = vmatprep.subr.mxu1 %v3161_v0 }
  0x55   :  { %1805 = vmatpush3.msra.mxu1 %v2438_v49 }
  0x56   :  { %1809 = vmatprep.subr.mxu1 %v3161_v0 }
  0xf0   :  { %v157_v51 = vpop.f32.mrf.mxu0 }
  0xf1   :  { %v232_v52 = vadd.f32 %v157_v51, %v90_v50 }
  0xf2   :  { %v159_v55 = vpop.f32.mrf.mxu0 }
  0xf3   :  { %v1561_v53 = vmul.f32 -1.442695, %v232_v52  ;;  %v242_v58 = vadd.f32 %v240_v54, %v159_v55  ;;  %v257_v52 = vrot.slane %v90_v50, 4 }
  0xf4   :  { %v228_v56 = vpop.f32.mrf.mxu1 }
  0xf5   :  { %2060 = vpow2.f32 %v1561_v53  ;;  %v1562_v59 = vmul.f32 -1.442695, %v242_v58  ;;  %v255_v63 = vadd.f32 %v2515_v62, %v228_v56 }
  0xf6   :  { %v1773_v57 = vpop.f32.mrf.mxu1 }
  0xf7   :  { %2062 = vpow2.f32 %v1562_v59 }
 0x102   :  { %v2061_v60 = vpop.eup %2060 }
 0x103   :  { %v236_v61 = vadd.f32 1.0, %v2061_v60 }
 0x104   :  { %v2063_v51 = vpop.eup %2062 }
 0x105   :  { %2064 = vrcp.f32 %v236_v61  ;;  %v246_v1 = vadd.f32 1.0, %v2063_v51 }
 0x112   :  { %v2065_v53 = vpop.eup %2064 }
 0x113   :  { %v256_v0 = vmul.f32 %v2065_v53, %v255_v63 }
 0x115   :  { %v259_v49 = vadd.f32 %v257_v52, %v256_v0  ;;  %v3186_v0 = vmov 0.0  }
 0x117   :  { %2066 = vtanh.f32 %v259_v49  ;;  %v1564_v49 = vld [vmem:[%s3155_s0 + $0x6] sm:$0x3f] }
 0x118   :  { %2068 = vrcp.f32 %v246_v1  ;;  %v3187_v1 = vld [vmem:[#allocation14_spill] sm:$0xff]  ;;  %v415_v51 = vrot.slane %v1564_v49, 2 }
 0x124   :  { %v2067_v54 = vpop.eup %2066 }
 0x125   :  { %v261_v55 = vsub.f32 %v2412_v44, %v2067_v54  ;;  %v2069_v57 = vpop.eup %2068  ;;  %v3188_v44 = vld [vmem:[#allocation9_spill] sm:$0xff] }
 0x127   :  { %v262_v58 = vmul.f32 %v2069_v57, %v261_v55 }
 0x129   :  { %v2519_v59 = vadd.f32 %v2067_v54, %v262_v58 }
 0x12b   :  { %331 = vmatmul.mubr.f32.vlgmr.msra.gmra.mxu0 %v2519_v59  ;;  %1807 = vmatmul.mubr.f32.vlgmr.msra.gmra.mxu1 %v2519_v59 }
 0x12c   :  { %436 = vmatpush1.msra.mxu0 %v2279_v2  ;;  %1810 = vmatpush3.msra.mxu1 %v2313_v14 }
 0x12d   :  { %437 = vmatprep.subr.mxu0 %v2281_v3  ;;  %1811 = vmatprep.subr.mxu1 %v3186_v0 }
 0x12e   :  { %438 = vmatpush1.msra.mxu0 %v2284_v4  ;;  %1812 = vmatpush3.msra.mxu1 %v2319_v16 }
 0x12f   :  { %439 = vmatprep.subr.mxu0 %v2287_v5  ;;  %1813 = vmatprep.subr.mxu1 %v3186_v0 }
 0x130   :  { %440 = vmatpush1.msra.mxu0 %v2290_v6  ;;  %1814 = vmatpush3.msra.mxu1 %v2325_v18 }
 0x131   :  { %441 = vmatprep.subr.mxu0 %v2293_v7  ;;  %1815 = vmatprep.subr.mxu1 %v3186_v0 }
 0x132   :  { %442 = vmatpush1.msra.mxu0 %v2296_v8  ;;  %1816 = vmatpush3.msra.mxu1 %v2335_v21 }
 0x133   :  { %443 = vmatprep.subr.mxu0 %v2299_v9  ;;  %1817 = vmatprep.subr.mxu1 %v3186_v0 }
 0x134   :  { %444 = vmatpush1.msra.mxu0 %v2302_v10  ;;  %1818 = vmatpush3.msra.mxu1 %v2345_v24 }
 0x135   :  { %445 = vmatprep.subr.mxu0 %v2305_v11  ;;  %1819 = vmatprep.subr.mxu1 %v3186_v0 }
 0x136   :  { %446 = vmatpush1.msra.mxu0 %v2308_v12  ;;  %1820 = vmatpush3.msra.mxu1 %v2355_v27 }
 0x137   :  { %447 = vmatprep.subr.mxu0 %v2311_v13  ;;  %1821 = vmatprep.subr.mxu1 %v3186_v0 }
 0x138   :  { %448 = vmatpush1.msra.mxu0 %v2316_v15  ;;  %1822 = vmatpush3.msra.mxu1 %v2365_v30 }
 0x139   :  { %449 = vmatprep.subr.mxu0 %v2322_v17  ;;  %1823 = vmatprep.subr.mxu1 %v3186_v0 }
 0x13a   :  { %450 = vmatpush1.msra.mxu0 %v2328_v19  ;;  %1824 = vmatpush3.msra.mxu1 %v2375_v33 }
 0x13b   :  { %451 = vmatprep.subr.mxu0 %v2332_v20  ;;  %1825 = vmatprep.subr.mxu1 %v3186_v0 }
 0x13c   :  { %452 = vmatpush1.msra.mxu0 %v2338_v22  ;;  %1826 = vmatpush3.msra.mxu1 %v2385_v36 }
 0x13d   :  { %453 = vmatprep.subr.mxu0 %v2342_v23  ;;  %1827 = vmatprep.subr.mxu1 %v3186_v0 }
 0x13e   :  { %454 = vmatpush1.msra.mxu0 %v2348_v25  ;;  %1828 = vmatpush3.msra.mxu1 %v2395_v39 }
 0x13f   :  { %455 = vmatprep.subr.mxu0 %v2352_v26  ;;  %1829 = vmatprep.subr.mxu1 %v3186_v0 }
 0x140   :  { %456 = vmatpush1.msra.mxu0 %v2358_v28  ;;  %1830 = vmatpush3.msra.mxu1 %v2405_v42 }
 0x141   :  { %457 = vmatprep.subr.mxu0 %v2362_v29  ;;  %1831 = vmatprep.subr.mxu1 %v3186_v0 }
 0x142   :  { %458 = vmatpush1.msra.mxu0 %v2368_v31  ;;  %1832 = vmatpush3.msra.mxu1 %v2415_v45 }
 0x143   :  { %459 = vmatprep.subr.mxu0 %v2372_v32  ;;  %1833 = vmatprep.subr.mxu1 %v3186_v0 }
 0x144   :  { %460 = vmatpush1.msra.mxu0 %v2378_v34  ;;  %1834 = vmatpush3.msra.mxu1 %v2421_v46 }
 0x145   :  { %461 = vmatprep.subr.mxu0 %v2382_v35  ;;  %1835 = vmatprep.subr.mxu1 %v3186_v0 }
 0x146   :  { %462 = vmatpush1.msra.mxu0 %v2388_v37  ;;  %1836 = vmatpush3.msra.mxu1 %v2426_v47 }
 0x147   :  { %463 = vmatprep.subr.mxu0 %v2392_v38  ;;  %1837 = vmatprep.subr.mxu1 %v3186_v0 }
 0x148   :  { %464 = vmatpush1.msra.mxu0 %v2398_v40  ;;  %1838 = vmatpush3.msra.mxu1 %v2432_v48 }
 0x149   :  { %465 = vmatprep.subr.mxu0 %v2402_v41  ;;  %1839 = vmatprep.subr.mxu1 %v3186_v0 }
 0x14a   :  { %466 = vmatpush1.msra.mxu0 %v2408_v43  ;;  %499 = vmatprep.mubr.f32.mxu0 %v3186_v0 }
 0x14b   :  { %1840 = vmatpush3.msra.mxu1 %v3187_v1  ;;  %1841 = vmatprep.mubr.msk.f32.mxu1 %vm2237_vm0, %v3186_v0 }
 0x14c   :  { %604 = vmatprep.subr.mxu0 %v3188_v44  ;;  %1844 = vmatprep.subr.mxu1 %v3186_v0  ;;  %v426_v44 = vrot.slane %v1564_v49, 4 }
 0x1eb   :  { %v332_v50 = vpop.f32.mrf.mxu0  ;;  %v403_v56 = vpop.f32.mrf.mxu1 }
 0x1ec   :  { %v407_v60 = vadd.f32 %v1564_v49, %v332_v50  ;;  %v424_v1 = vadd.f32 %v2515_v62, %v403_v56 }
 0x1ed   :  { %v1808_v61 = vpop.f32.mrf.mxu1  ;;  %v334_v52 = vpop.f32.mrf.mxu0 }
 0x1ee   :  { %v1565_v63 = vmul.f32 -1.442695, %v407_v60  ;;  %v417_v53 = vadd.f32 %v415_v51, %v334_v52 }
 0x1f0   :  { %2070 = vpow2.f32 %v1565_v63  ;;  %v1566_v54 = vmul.f32 -1.442695, %v417_v53 }
 0x1f2   :  { %2072 = vpow2.f32 %v1566_v54 }
 0x1fd   :  { %v2071_v55 = vpop.eup %2070 }
 0x1fe   :  { %v411_v57 = vadd.f32 1.0, %v2071_v55 }
 0x1ff   :  { %v2073_v58 = vpop.eup %2072 }
 0x200   :  { %2074 = vrcp.f32 %v411_v57  ;;  %v421_v40 = vadd.f32 1.0, %v2073_v58 }
 0x20d   :  { %v2075_v43 = vpop.eup %2074 }
 0x20e   :  { %v425_v41 = vmul.f32 %v2075_v43, %v424_v1  ;;  %v3191_v43 = vld [vmem:[#allocation11_spill] sm:$0xff]  ;;  %v3194_v1 = vld [vmem:[#allocation9_spill] sm:$0xff] }
 0x210   :  { %v428_v48 = vadd.f32 %v426_v44, %v425_v41  ;;  %v3190_v41 = vld [vmem:[#allocation13_spill] sm:$0xff]  ;;  %v1567_v44 = vld [vmem:[%s3155_s0 + $0xc] sm:$0x3f] }
 0x211   :  { %v584_v55 = vrot.slane %v1567_v44, 2 }
 0x212   :  { %2076 = vtanh.f32 %v428_v48  ;;  %v3192_v48 = vld [vmem:[#allocation12_spill] sm:$0xff] }
 0x213   :  { %2078 = vrcp.f32 %v421_v40  ;;  %v3189_v40 = vld [vmem:[#allocation10_spill] sm:$0xff] }
 0x21f   :  { %v2077_v50 = vpop.eup %2076 }
 0x220   :  { %v430_v60 = vsub.f32 %v2519_v59, %v2077_v50  ;;  %v2079_v61 = vpop.eup %2078  ;;  %v3193_v59 = vld [vmem:[#allocation14_spill] sm:$0xff] }
 0x222   :  { %v431_v63 = vmul.f32 %v2079_v61, %v430_v60 }
 0x224   :  { %v2595_v51 = vadd.f32 %v2077_v50, %v431_v63 }
 0x226   :  { %500 = vmatmul.mubr.f32.vlgmr.msra.gmra.mxu0 %v2595_v51  ;;  %1842 = vmatmul.mubr.f32.vlgmr.msra.gmra.mxu1 %v2595_v51 }
 0x227   :  { %605 = vmatpush1.msra.mxu0 %v2279_v2  ;;  %1845 = vmatpush3.msra.mxu1 %v2313_v14 }
 0x228   :  { %606 = vmatprep.subr.mxu0 %v2281_v3  ;;  %1846 = vmatprep.subr.mxu1 %v3186_v0 }
 0x229   :  { %607 = vmatpush1.msra.mxu0 %v2284_v4  ;;  %1847 = vmatpush3.msra.mxu1 %v2319_v16 }
 0x22a   :  { %608 = vmatprep.subr.mxu0 %v2287_v5  ;;  %1848 = vmatprep.subr.mxu1 %v3186_v0 }
 0x22b   :  { %609 = vmatpush1.msra.mxu0 %v2290_v6  ;;  %1849 = vmatpush3.msra.mxu1 %v2325_v18 }
 0x22c   :  { %610 = vmatprep.subr.mxu0 %v2293_v7  ;;  %1850 = vmatprep.subr.mxu1 %v3186_v0 }
 0x22d   :  { %611 = vmatpush1.msra.mxu0 %v2296_v8  ;;  %1851 = vmatpush3.msra.mxu1 %v2335_v21 }
 0x22e   :  { %612 = vmatprep.subr.mxu0 %v2299_v9  ;;  %1852 = vmatprep.subr.mxu1 %v3186_v0 }
 0x22f   :  { %613 = vmatpush1.msra.mxu0 %v2302_v10  ;;  %1853 = vmatpush3.msra.mxu1 %v2345_v24 }
 0x230   :  { %614 = vmatprep.subr.mxu0 %v2305_v11  ;;  %1854 = vmatprep.subr.mxu1 %v3186_v0 }
 0x231   :  { %615 = vmatpush1.msra.mxu0 %v2308_v12  ;;  %1855 = vmatpush3.msra.mxu1 %v2355_v27 }
 0x232   :  { %616 = vmatprep.subr.mxu0 %v2311_v13  ;;  %1856 = vmatprep.subr.mxu1 %v3186_v0 }
 0x233   :  { %617 = vmatpush1.msra.mxu0 %v2316_v15  ;;  %1857 = vmatpush3.msra.mxu1 %v2365_v30 }
 0x234   :  { %618 = vmatprep.subr.mxu0 %v2322_v17  ;;  %1858 = vmatprep.subr.mxu1 %v3186_v0 }
 0x235   :  { %619 = vmatpush1.msra.mxu0 %v2328_v19  ;;  %1859 = vmatpush3.msra.mxu1 %v2375_v33 }
 0x236   :  { %620 = vmatprep.subr.mxu0 %v2332_v20  ;;  %1860 = vmatprep.subr.mxu1 %v3186_v0 }
 0x237   :  { %621 = vmatpush1.msra.mxu0 %v2338_v22  ;;  %1861 = vmatpush3.msra.mxu1 %v2385_v36 }
 0x238   :  { %622 = vmatprep.subr.mxu0 %v2342_v23  ;;  %1862 = vmatprep.subr.mxu1 %v3186_v0 }
 0x239   :  { %623 = vmatpush1.msra.mxu0 %v2348_v25  ;;  %1863 = vmatpush3.msra.mxu1 %v2395_v39 }
 0x23a   :  { %624 = vmatprep.subr.mxu0 %v2352_v26  ;;  %1864 = vmatprep.subr.mxu1 %v3186_v0 }
 0x23b   :  { %625 = vmatpush1.msra.mxu0 %v2358_v28  ;;  %1865 = vmatpush3.msra.mxu1 %v2405_v42 }
 0x23c   :  { %626 = vmatprep.subr.mxu0 %v2362_v29  ;;  %1866 = vmatprep.subr.mxu1 %v3186_v0 }
 0x23d   :  { %627 = vmatpush1.msra.mxu0 %v2368_v31  ;;  %1867 = vmatpush3.msra.mxu1 %v2415_v45 }
 0x23e   :  { %628 = vmatprep.subr.mxu0 %v2372_v32  ;;  %1868 = vmatprep.subr.mxu1 %v3186_v0 }
 0x23f   :  { %629 = vmatpush1.msra.mxu0 %v2378_v34  ;;  %1869 = vmatpush3.msra.mxu1 %v2421_v46 }
 0x240   :  { %630 = vmatprep.subr.mxu0 %v2382_v35  ;;  %1870 = vmatprep.subr.mxu1 %v3186_v0 }
 0x241   :  { %631 = vmatpush1.msra.mxu0 %v2388_v37  ;;  %1871 = vmatpush3.msra.mxu1 %v2426_v47 }
 0x242   :  { %632 = vmatprep.subr.mxu0 %v2392_v38  ;;  %1872 = vmatprep.subr.mxu1 %v3186_v0 }
 0x243   :  { %633 = vmatpush1.msra.mxu0 %v3189_v40  ;;  %1873 = vmatpush3.msra.mxu1 %v3190_v41 }
 0x244   :  { %634 = vmatprep.subr.mxu0 %v3191_v43  ;;  %1874 = vmatprep.subr.mxu1 %v3186_v0 }
 0x245   :  { %635 = vmatpush1.msra.mxu0 %v3192_v48  ;;  %668 = vmatprep.mubr.f32.mxu0 %v3186_v0 }
 0x246   :  { %1875 = vmatpush3.msra.mxu1 %v3193_v59  ;;  %1876 = vmatprep.mubr.msk.f32.mxu1 %vm2237_vm0, %v3186_v0 }
 0x247   :  { %773 = vmatprep.subr.mxu0 %v3194_v1  ;;  %1879 = vmatprep.subr.mxu1 %v3186_v0  ;;  %v595_v1 = vrot.slane %v1567_v44, 4 }
 0x2e6   :  { %v501_v49 = vpop.f32.mrf.mxu0  ;;  %v572_v56 = vpop.f32.mrf.mxu1 }
 0x2e7   :  { %v576_v52 = vadd.f32 %v1567_v44, %v501_v49  ;;  %v593_v59 = vadd.f32 %v2515_v62, %v572_v56 }
 0x2e8   :  { %v1843_v53 = vpop.f32.mrf.mxu1  ;;  %v503_v57 = vpop.f32.mrf.mxu0 }
 0x2e9   :  { %v1568_v54 = vmul.f32 -1.442695, %v576_v52  ;;  %v586_v58 = vadd.f32 %v584_v55, %v503_v57 }
 0x2eb   :  { %2080 = vpow2.f32 %v1568_v54  ;;  %v1569_v50 = vmul.f32 -1.442695, %v586_v58 }
 0x2ed   :  { %2082 = vpow2.f32 %v1569_v50 }
 0x2f8   :  { %v2081_v60 = vpop.eup %2080 }
 0x2f9   :  { %v580_v61 = vadd.f32 1.0, %v2081_v60 }
 0x2fa   :  { %v2083_v63 = vpop.eup %2082 }
 0x2fb   :  { %2084 = vrcp.f32 %v580_v61  ;;  %v590_v40 = vadd.f32 1.0, %v2083_v63 }
 0x308   :  { %v2085_v48 = vpop.eup %2084 }
 0x309   :  { %v594_v43 = vmul.f32 %v2085_v48, %v593_v59  ;;  %v3199_v48 = vld [vmem:[#allocation14_spill] sm:$0xff]  ;;  %v3200_v59 = vld [vmem:[#allocation9_spill] sm:$0xff] }
 0x30b   :  { %v597_v41 = vadd.f32 %v595_v1, %v594_v43  ;;  %v3198_v43 = vld [vmem:[#allocation12_spill] sm:$0xff]  ;;  %v1570_v1 = vld [vmem:[%s3155_s0 + $0x12] sm:$0x3f] }
 0x30c   :  { %v753_v60 = vrot.slane %v1570_v1, 2 }
 0x30d   :  { %2086 = vtanh.f32 %v597_v41  ;;  %v3197_v41 = vld [vmem:[#allocation11_spill] sm:$0xff] }
 0x30e   :  { %2088 = vrcp.f32 %v590_v40  ;;  %v3196_v40 = vld [vmem:[#allocation13_spill] sm:$0xff] }
 0x31a   :  { %v2087_v49 = vpop.eup %2086 }
 0x31b   :  { %v599_v52 = vsub.f32 %v2595_v51, %v2087_v49  ;;  %v2089_v53 = vpop.eup %2088  ;;  %v3195_v51 = vld [vmem:[#allocation10_spill] sm:$0xff] }
 0x31d   :  { %v600_v54 = vmul.f32 %v2089_v53, %v599_v52 }
 0x31f   :  { %v2671_v55 = vadd.f32 %v2087_v49, %v600_v54 }
 0x321   :  { %669 = vmatmul.mubr.f32.vlgmr.msra.gmra.mxu0 %v2671_v55  ;;  %1877 = vmatmul.mubr.f32.vlgmr.msra.gmra.mxu1 %v2671_v55 }
 0x322   :  { %774 = vmatpush1.msra.mxu0 %v2279_v2  ;;  %1880 = vmatpush3.msra.mxu1 %v2313_v14 }
 0x323   :  { %775 = vmatprep.subr.mxu0 %v2281_v3  ;;  %1881 = vmatprep.subr.mxu1 %v3186_v0 }
 0x324   :  { %776 = vmatpush1.msra.mxu0 %v2284_v4  ;;  %1882 = vmatpush3.msra.mxu1 %v2319_v16 }
 0x325   :  { %777 = vmatprep.subr.mxu0 %v2287_v5  ;;  %1883 = vmatprep.subr.mxu1 %v3186_v0 }
 0x326   :  { %778 = vmatpush1.msra.mxu0 %v2290_v6  ;;  %1884 = vmatpush3.msra.mxu1 %v2325_v18 }
 0x327   :  { %779 = vmatprep.subr.mxu0 %v2293_v7  ;;  %1885 = vmatprep.subr.mxu1 %v3186_v0 }
 0x328   :  { %780 = vmatpush1.msra.mxu0 %v2296_v8  ;;  %1886 = vmatpush3.msra.mxu1 %v2335_v21 }
 0x329   :  { %781 = vmatprep.subr.mxu0 %v2299_v9  ;;  %1887 = vmatprep.subr.mxu1 %v3186_v0 }
 0x32a   :  { %782 = vmatpush1.msra.mxu0 %v2302_v10  ;;  %1888 = vmatpush3.msra.mxu1 %v2345_v24 }
 0x32b   :  { %783 = vmatprep.subr.mxu0 %v2305_v11  ;;  %1889 = vmatprep.subr.mxu1 %v3186_v0 }
 0x32c   :  { %784 = vmatpush1.msra.mxu0 %v2308_v12  ;;  %1890 = vmatpush3.msra.mxu1 %v2355_v27 }
 0x32d   :  { %785 = vmatprep.subr.mxu0 %v2311_v13  ;;  %1891 = vmatprep.subr.mxu1 %v3186_v0 }
 0x32e   :  { %786 = vmatpush1.msra.mxu0 %v2316_v15  ;;  %1892 = vmatpush3.msra.mxu1 %v2365_v30 }
 0x32f   :  { %787 = vmatprep.subr.mxu0 %v2322_v17  ;;  %1893 = vmatprep.subr.mxu1 %v3186_v0 }
 0x330   :  { %788 = vmatpush1.msra.mxu0 %v2328_v19  ;;  %1894 = vmatpush3.msra.mxu1 %v2375_v33 }
 0x331   :  { %789 = vmatprep.subr.mxu0 %v2332_v20  ;;  %1895 = vmatprep.subr.mxu1 %v3186_v0 }
 0x332   :  { %790 = vmatpush1.msra.mxu0 %v2338_v22  ;;  %1896 = vmatpush3.msra.mxu1 %v2385_v36 }
 0x333   :  { %791 = vmatprep.subr.mxu0 %v2342_v23  ;;  %1897 = vmatprep.subr.mxu1 %v3186_v0 }
 0x334   :  { %792 = vmatpush1.msra.mxu0 %v2348_v25  ;;  %1898 = vmatpush3.msra.mxu1 %v2395_v39 }
 0x335   :  { %793 = vmatprep.subr.mxu0 %v2352_v26  ;;  %1899 = vmatprep.subr.mxu1 %v3186_v0 }
 0x336   :  { %794 = vmatpush1.msra.mxu0 %v2358_v28  ;;  %1900 = vmatpush3.msra.mxu1 %v2405_v42 }
 0x337   :  { %795 = vmatprep.subr.mxu0 %v2362_v29  ;;  %1901 = vmatprep.subr.mxu1 %v3186_v0 }
 0x338   :  { %796 = vmatpush1.msra.mxu0 %v2368_v31  ;;  %1902 = vmatpush3.msra.mxu1 %v2415_v45 }
 0x339   :  { %797 = vmatprep.subr.mxu0 %v2372_v32  ;;  %1903 = vmatprep.subr.mxu1 %v3186_v0 }
 0x33a   :  { %798 = vmatpush1.msra.mxu0 %v2378_v34  ;;  %1904 = vmatpush3.msra.mxu1 %v2421_v46 }
 0x33b   :  { %799 = vmatprep.subr.mxu0 %v2382_v35  ;;  %1905 = vmatprep.subr.mxu1 %v3186_v0 }
 0x33c   :  { %800 = vmatpush1.msra.mxu0 %v2388_v37  ;;  %1906 = vmatpush3.msra.mxu1 %v2426_v47 }
 0x33d   :  { %801 = vmatprep.subr.mxu0 %v2392_v38  ;;  %1907 = vmatprep.subr.mxu1 %v3186_v0 }
 0x33e   :  { %802 = vmatpush1.msra.mxu0 %v3195_v51  ;;  %1908 = vmatpush3.msra.mxu1 %v3196_v40 }
 0x33f   :  { %803 = vmatprep.subr.mxu0 %v3197_v41  ;;  %1909 = vmatprep.subr.mxu1 %v3186_v0 }
 0x340   :  { %804 = vmatpush1.msra.mxu0 %v3198_v43  ;;  %837 = vmatprep.mubr.f32.mxu0 %v3186_v0 }
 0x341   :  { %1910 = vmatpush3.msra.mxu1 %v3199_v48  ;;  %1911 = vmatprep.mubr.msk.f32.mxu1 %vm2237_vm0, %v3186_v0 }
 0x342   :  { %942 = vmatprep.subr.mxu0 %v3200_v59  ;;  %1914 = vmatprep.subr.mxu1 %v3186_v0  ;;  %v764_v59 = vrot.slane %v1570_v1, 4 }
 0x3e1   :  { %v670_v44 = vpop.f32.mrf.mxu0  ;;  %v741_v56 = vpop.f32.mrf.mxu1 }
 0x3e2   :  { %v745_v57 = vadd.f32 %v1570_v1, %v670_v44  ;;  %v762_v48 = vadd.f32 %v2515_v62, %v741_v56  ;;  %v2889_v1 = vld [vmem:[#allocation3 + $0xd8] sm:$0xff]  ;;  %v2892_v56 = vld [vmem:[#allocation3 + $0xe8] sm:$0xff] }
 0x3e3   :  { %v1878_v58 = vpop.f32.mrf.mxu1  ;;  %v672_v61 = vpop.f32.mrf.mxu0 }
 0x3e4   :  { %v1571_v50 = vmul.f32 -1.442695, %v745_v57  ;;  %v755_v63 = vadd.f32 %v753_v60, %v672_v61  ;;  %v2895_v61 = vld [vmem:[#allocation3 + $0xc8] sm:$0xff] }
 0x3e6   :  { %2090 = vpow2.f32 %v1571_v50  ;;  %v1572_v49 = vmul.f32 -1.442695, %v755_v63  ;;  %v2899_v63 = vld [vmem:[#allocation3 + $0xc0] sm:$0xff] }
 0x3e8   :  { %2092 = vpow2.f32 %v1572_v49  ;;  %v2902_v49 = vld [vmem:[#allocation3 + $0xd0] sm:$0xff] }
 0x3f3   :  { %v2091_v52 = vpop.eup %2090 }
 0x3f4   :  { %v749_v53 = vadd.f32 1.0, %v2091_v52  ;;  %v2905_v52 = vld [vmem:[#allocation3 + $0xb0] sm:$0xff] }
 0x3f5   :  { %v2093_v54 = vpop.eup %2092 }
 0x3f6   :  { %2094 = vrcp.f32 %v749_v53  ;;  %v759_v51 = vadd.f32 1.0, %v2093_v54  ;;  %v2909_v53 = vld [vmem:[#allocation3 + $0xa8] sm:$0xff]  ;;  %v2912_v54 = vld [vmem:[#allocation3 + $0xb8] sm:$0xff] }
 0x403   :  { %v2095_v43 = vpop.eup %2094 }
 0x404   :  { %v763_v41 = vmul.f32 %v2095_v43, %v762_v48  ;;  %v2882_v43 = vld [vmem:[#allocation3 + $0x100] sm:$0xff] }
 0x405   :  { %v2885_v48 = vld [vmem:[#allocation3 + $0xe0] sm:$0xff] }
 0x406   :  { %v766_v40 = vadd.f32 %v764_v59, %v763_v41  ;;  %v2879_v41 = vld [vmem:[#allocation3 + $0xf0] sm:$0xff]  ;;  %v2915_v59 = vld [vmem:[#allocation3 + $0x98] sm:$0xff] }
 0x408   :  { %2096 = vtanh.f32 %v766_v40  ;;  %v2875_v40 = vld [vmem:[#allocation3 + $0xf8] sm:$0xff] }
 0x409   :  { %2098 = vrcp.f32 %v759_v51  ;;  %v2872_v51 = vld [vmem:[#allocation3 + $0x118] sm:$0xff] }
 0x415   :  { %v2097_v44 = vpop.eup %2096 }
 0x416   :  { %v768_v57 = vsub.f32 %v2671_v55, %v2097_v44  ;;  %v2099_v58 = vpop.eup %2098  ;;  %v2869_v55 = vld [vmem:[#allocation3 + $0x108] sm:$0xff] }
 0x418   :  { %v769_v50 = vmul.f32 %v2099_v58, %v768_v57  ;;  %v2922_v57 = vld [vmem:[#allocation3 + $0xa0] sm:$0xff] }
 0x419   :  { %v2925_v58 = vld [vmem:[#allocation3 + $0x80] sm:$0xff] }
 0x41a   :  { %v2747_v60 = vadd.f32 %v2097_v44, %v769_v50  ;;  %v2919_v44 = vld [vmem:[#allocation3 + $0x90] sm:$0xff]  ;;  %v2929_v50 = vld [vmem:[#allocation3 + $0x78] sm:$0xff] }
 0x41c   :  { %838 = vmatmul.mubr.f32.vlgmr.msra.gmra.mxu0 %v2747_v60  ;;  %1912 = vmatmul.mubr.f32.vlgmr.msra.gmra.mxu1 %v2747_v60 }
 0x41d   :  { %943 = vmatpush1.msra.mxu0 %v2279_v2  ;;  %1915 = vmatpush3.msra.mxu1 %v2313_v14  ;;  %v3201_v2 = vld [vmem:[#allocation10_spill] sm:$0xff] }
 0x41e   :  { %944 = vmatprep.subr.mxu0 %v2281_v3  ;;  %1916 = vmatprep.subr.mxu1 %v3186_v0  ;;  %v3202_v3 = vld [vmem:[#allocation13_spill] sm:$0xff] }
 0x41f   :  { %945 = vmatpush1.msra.mxu0 %v2284_v4  ;;  %1917 = vmatpush3.msra.mxu1 %v2319_v16  ;;  %v3203_v4 = vld [vmem:[#allocation11_spill] sm:$0xff] }
 0x420   :  { %946 = vmatprep.subr.mxu0 %v2287_v5  ;;  %1918 = vmatprep.subr.mxu1 %v3186_v0  ;;  %v3204_v5 = vld [vmem:[#allocation12_spill] sm:$0xff] }
 0x421   :  { %947 = vmatpush1.msra.mxu0 %v2290_v6  ;;  %1919 = vmatpush3.msra.mxu1 %v2325_v18  ;;  %v3205_v6 = vld [vmem:[#allocation14_spill] sm:$0xff] }
 0x422   :  { %948 = vmatprep.subr.mxu0 %v2293_v7  ;;  %1920 = vmatprep.subr.mxu1 %v3186_v0  ;;  %v2816_v7 = vld [vmem:[#allocation3 + $0x170] sm:$0xff] }
 0x423   :  { %949 = vmatpush1.msra.mxu0 %v2296_v8  ;;  %1921 = vmatpush3.msra.mxu1 %v2335_v21  ;;  %v1573_v8 = vld [vmem:[%s3155_s0 + $0x18] sm:$0x3f] }
 0x424   :  { %950 = vmatprep.subr.mxu0 %v2299_v9  ;;  %1922 = vmatprep.subr.mxu1 %v3186_v0  ;;  %v922_v14 = vrot.slane %v1573_v8, 2  ;;  %v933_v21 = vrot.slane %v1573_v8, 4 }
 0x425   :  { %951 = vmatpush1.msra.mxu0 %v2302_v10  ;;  %1923 = vmatpush3.msra.mxu1 %v2345_v24 }
 0x426   :  { %952 = vmatprep.subr.mxu0 %v2305_v11  ;;  %1924 = vmatprep.subr.mxu1 %v3186_v0 }
 0x427   :  { %953 = vmatpush1.msra.mxu0 %v2308_v12  ;;  %1925 = vmatpush3.msra.mxu1 %v2355_v27 }
 0x428   :  { %954 = vmatprep.subr.mxu0 %v2311_v13  ;;  %1926 = vmatprep.subr.mxu1 %v3186_v0 }
 0x429   :  { %955 = vmatpush1.msra.mxu0 %v2316_v15  ;;  %1927 = vmatpush3.msra.mxu1 %v2365_v30 }
 0x42a   :  { %956 = vmatprep.subr.mxu0 %v2322_v17  ;;  %1928 = vmatprep.subr.mxu1 %v3186_v0 }
 0x42b   :  { %957 = vmatpush1.msra.mxu0 %v2328_v19  ;;  %1929 = vmatpush3.msra.mxu1 %v2375_v33  ;;  %v2832_v33 = vld [vmem:[#allocation3 + $0x178] sm:$0xff] }
 0x42c   :  { %958 = vmatprep.subr.mxu0 %v2332_v20  ;;  %1930 = vmatprep.subr.mxu1 %v3186_v0 }
 0x42d   :  { %959 = vmatpush1.msra.mxu0 %v2338_v22  ;;  %1931 = vmatpush3.msra.mxu1 %v2385_v36  ;;  %v2842_v36 = vld [vmem:[#allocation3 + $0x160] sm:$0xff] }
 0x42e   :  { %960 = vmatprep.subr.mxu0 %v2342_v23  ;;  %1932 = vmatprep.subr.mxu1 %v3186_v0 }
 0x42f   :  { %961 = vmatpush1.msra.mxu0 %v2348_v25  ;;  %1933 = vmatpush3.msra.mxu1 %v2395_v39  ;;  %v2852_v39 = vld [vmem:[#allocation3 + $0x148] sm:$0xff] }
 0x430   :  { %962 = vmatprep.subr.mxu0 %v2352_v26  ;;  %1934 = vmatprep.subr.mxu1 %v3186_v0 }
 0x431   :  { %963 = vmatpush1.msra.mxu0 %v2358_v28  ;;  %1935 = vmatpush3.msra.mxu1 %v2405_v42  ;;  %v2855_v42 = vld [vmem:[#allocation3 + $0x128] sm:$0xff] }
 0x432   :  { %964 = vmatprep.subr.mxu0 %v2362_v29  ;;  %1936 = vmatprep.subr.mxu1 %v3186_v0 }
 0x433   :  { %965 = vmatpush1.msra.mxu0 %v2368_v31  ;;  %1937 = vmatpush3.msra.mxu1 %v2415_v45  ;;  %v2859_v45 = vld [vmem:[#allocation3 + $0x120] sm:$0xff] }
 0x434   :  { %966 = vmatprep.subr.mxu0 %v2372_v32  ;;  %1938 = vmatprep.subr.mxu1 %v3186_v0  ;;  %v2829_v32 = vld [vmem:[#allocation3 + $0x168] sm:$0xff] }
 0x435   :  { %967 = vmatpush1.msra.mxu0 %v2378_v34  ;;  %1939 = vmatpush3.msra.mxu1 %v2421_v46  ;;  %v2835_v34 = vld [vmem:[#allocation3 + $0x158] sm:$0xff]  ;;  %v2862_v46 = vld [vmem:[#allocation3 + $0x130] sm:$0xff] }
 0x436   :  { %968 = vmatprep.subr.mxu0 %v2382_v35  ;;  %1940 = vmatprep.subr.mxu1 %v3186_v0  ;;  %v2839_v35 = vld [vmem:[#allocation3 + $0x150] sm:$0xff] }
 0x437   :  { %969 = vmatpush1.msra.mxu0 %v2388_v37  ;;  %1941 = vmatpush3.msra.mxu1 %v2426_v47  ;;  %v2845_v37 = vld [vmem:[#allocation3 + $0x140] sm:$0xff]  ;;  %v2865_v47 = vld [vmem:[#allocation3 + $0x110] sm:$0xff] }
 0x438   :  { %970 = vmatprep.subr.mxu0 %v2392_v38  ;;  %1942 = vmatprep.subr.mxu1 %v3186_v0  ;;  %v2849_v38 = vld [vmem:[#allocation3 + $0x138] sm:$0xff] }
 0x439   :  { %971 = vmatpush1.msra.mxu0 %v3201_v2  ;;  %1943 = vmatpush3.msra.mxu1 %v3202_v3  ;;  %v2935_v2 = vld [vmem:[#allocation3 + $0x68] sm:$0xff]  ;;  %v2939_v3 = vld [vmem:[#allocation3 + $0x60] sm:$0xff] }
 0x43a   :  { %972 = vmatprep.subr.mxu0 %v3203_v4  ;;  %1944 = vmatprep.subr.mxu1 %v3186_v0  ;;  %v2942_v4 = vld [vmem:[#allocation3 + $0x70] sm:$0xff] }
 0x43b   :  { %973 = vmatpush1.msra.mxu0 %v3204_v5  ;;  %1006 = vmatprep.mubr.f32.mxu0 %v3186_v0  ;;  %v2945_v5 = vld [vmem:[#allocation3 + $0x50] sm:$0xff] }
 0x43c   :  { %1945 = vmatpush3.msra.mxu1 %v3205_v6  ;;  %1946 = vmatprep.mubr.msk.f32.mxu1 %vm2237_vm0, %v3186_v0  ;;  %v2949_v6 = vld [vmem:[#allocation3 + $0x48] sm:$0xff] }
 0x43d   :  { %1111 = vmatprep.subr.mxu0 %v2816_v7  ;;  %1949 = vmatprep.subr.mxu1 %v3186_v0 }
 0x4dc   :  { %v839_v9 = vpop.f32.mrf.mxu0  ;;  %v910_v10 = vpop.f32.mrf.mxu1 }
 0x4dd   :  { %v914_v11 = vadd.f32 %v1573_v8, %v839_v9  ;;  %v931_v22 = vadd.f32 %v2515_v62, %v910_v10  ;;  %v2952_v8 = vld [vmem:[#allocation3 + $0x58] sm:$0xff]  ;;  %v2959_v10 = vld [vmem:[#allocation3 + $0x30] sm:$0xff] }
 0x4de   :  { %v1913_v12 = vpop.f32.mrf.mxu1  ;;  %v841_v15 = vpop.f32.mrf.mxu0  ;;  %v2955_v9 = vld [vmem:[#allocation3 + $0x38] sm:$0xff] }
 0x4df   :  { %v1574_v13 = vmul.f32 -1.442695, %v914_v11  ;;  %v924_v16 = vadd.f32 %v922_v14, %v841_v15  ;;  %v2962_v11 = vld [vmem:[#allocation3 + $0x40] sm:$0xff]  ;;  %v2972_v14 = vld [vmem:[#allocation3 + $0x28] sm:$0xff] }
 0x4e0   :  { %v2965_v12 = vld [vmem:[#allocation3 + $0x20] sm:$0xff]  ;;  %3207 = vst [vmem:[#allocation10_spill] sm:$0xff] %v2972_v14  ;;  %v2975_v15 = vld [vmem:[#allocation3 + $0x8] sm:$0xff] }
 0x4e1   :  { %2100 = vpow2.f32 %v1574_v13  ;;  %v1575_v17 = vmul.f32 -1.442695, %v924_v16  ;;  %v2969_v13 = vld [vmem:[#allocation3 + $0x18] sm:$0xff]  ;;  %3208 = vst [vmem:[#allocation13_spill] sm:$0xff] %v2975_v15  ;;  %v2979_v16 = vld [vmem:[#allocation3] sm:$0xff] }
 0x4e2   :  { %3206 = vst [vmem:[#allocation9_spill] sm:$0xff] %v2969_v13  ;;  %3209 = vst [vmem:[#allocation11_spill] sm:$0xff] %v2979_v16 }
 0x4e3   :  { %2102 = vpow2.f32 %v1575_v17  ;;  %v2983_v17 = vld [vmem:[#allocation3 + $0x10] sm:$0xff] }
 0x4e4   :  { %3210 = vst [vmem:[#allocation12_spill] sm:$0xff] %v2983_v17 }
 0x4ee   :  { %v2101_v18 = vpop.eup %2100 }
 0x4ef   :  { %v918_v19 = vadd.f32 1.0, %v2101_v18  ;;  %v1576_v18 = vld [vmem:[%s3155_s0 + $0x1e] sm:$0x3f] }
 0x4f0   :  { %v2103_v20 = vpop.eup %2102 }
 0x4f1   :  { %2104 = vrcp.f32 %v918_v19  ;;  %v928_v26 = vadd.f32 1.0, %v2103_v20 }
 0x4fe   :  { %v2105_v23 = vpop.eup %2104 }
 0x4ff   :  { %v932_v24 = vmul.f32 %v2105_v23, %v931_v22 }
 0x501   :  { %v935_v25 = vadd.f32 %v933_v21, %v932_v24  ;;  %v1091_v24 = vrot.slane %v1576_v18, 2 }
 0x503   :  { %2106 = vtanh.f32 %v935_v25 }
 0x504   :  { %2108 = vrcp.f32 %v928_v26 }
 0x510   :  { %v2107_v27 = vpop.eup %2106 }
 0x511   :  { %v937_v28 = vsub.f32 %v2747_v60, %v2107_v27  ;;  %v2109_v29 = vpop.eup %2108  ;;  %v2932_v60 = vld [vmem:[#allocation3 + $0x88] sm:$0xff] }
 0x513   :  { %v938_v30 = vmul.f32 %v2109_v29, %v937_v28 }
 0x515   :  { %v2825_v31 = vadd.f32 %v2107_v27, %v938_v30  ;;  %v1102_v30 = vrot.slane %v1576_v18, 4 }
 0x517   :  { %1007 = vmatmul.mubr.f32.vlgmr.msra.gmra.mxu0 %v2825_v31  ;;  %1947 = vmatmul.mubr.f32.vlgmr.msra.gmra.mxu1 %v2825_v31 }
 0x518   :  { %1112 = vmatpush1.msra.mxu0 %v2829_v32  ;;  %1950 = vmatpush3.msra.mxu1 %v2832_v33 }
 0x519   :  { %1113 = vmatprep.subr.mxu0 %v2835_v34  ;;  %1951 = vmatprep.subr.mxu1 %v3186_v0 }
 0x51a   :  { %1114 = vmatpush1.msra.mxu0 %v2839_v35  ;;  %1952 = vmatpush3.msra.mxu1 %v2842_v36 }
 0x51b   :  { %1115 = vmatprep.subr.mxu0 %v2845_v37  ;;  %1953 = vmatprep.subr.mxu1 %v3186_v0 }
 0x51c   :  { %1116 = vmatpush1.msra.mxu0 %v2849_v38  ;;  %1954 = vmatpush3.msra.mxu1 %v2852_v39 }
 0x51d   :  { %1117 = vmatprep.subr.mxu0 %v2855_v42  ;;  %1955 = vmatprep.subr.mxu1 %v3186_v0 }
 0x51e   :  { %1118 = vmatpush1.msra.mxu0 %v2859_v45  ;;  %1956 = vmatpush3.msra.mxu1 %v2862_v46 }
 0x51f   :  { %1119 = vmatprep.subr.mxu0 %v2865_v47  ;;  %1957 = vmatprep.subr.mxu1 %v3186_v0 }
 0x520   :  { %1120 = vmatpush1.msra.mxu0 %v2869_v55  ;;  %1958 = vmatpush3.msra.mxu1 %v2872_v51 }
 0x521   :  { %1121 = vmatprep.subr.mxu0 %v2875_v40  ;;  %1959 = vmatprep.subr.mxu1 %v3186_v0 }
 0x522   :  { %1122 = vmatpush1.msra.mxu0 %v2879_v41  ;;  %1960 = vmatpush3.msra.mxu1 %v2882_v43 }
 0x523   :  { %1123 = vmatprep.subr.mxu0 %v2885_v48  ;;  %1961 = vmatprep.subr.mxu1 %v3186_v0 }
 0x524   :  { %1124 = vmatpush1.msra.mxu0 %v2889_v1  ;;  %1962 = vmatpush3.msra.mxu1 %v2892_v56 }
 0x525   :  { %1125 = vmatprep.subr.mxu0 %v2895_v61  ;;  %1963 = vmatprep.subr.mxu1 %v3186_v0 }
 0x526   :  { %1126 = vmatpush1.msra.mxu0 %v2899_v63  ;;  %1964 = vmatpush3.msra.mxu1 %v2902_v49 }
 0x527   :  { %1127 = vmatprep.subr.mxu0 %v2905_v52  ;;  %1965 = vmatprep.subr.mxu1 %v3186_v0 }
 0x528   :  { %1128 = vmatpush1.msra.mxu0 %v2909_v53  ;;  %1966 = vmatpush3.msra.mxu1 %v2912_v54 }
 0x529   :  { %1129 = vmatprep.subr.mxu0 %v2915_v59  ;;  %1967 = vmatprep.subr.mxu1 %v3186_v0 }
 0x52a   :  { %1130 = vmatpush1.msra.mxu0 %v2919_v44  ;;  %1968 = vmatpush3.msra.mxu1 %v2922_v57 }
 0x52b   :  { %1131 = vmatprep.subr.mxu0 %v2925_v58  ;;  %1969 = vmatprep.subr.mxu1 %v3186_v0 }
 0x52c   :  { %1132 = vmatpush1.msra.mxu0 %v2929_v50  ;;  %1970 = vmatpush3.msra.mxu1 %v2932_v60 }
 0x52d   :  { %1133 = vmatprep.subr.mxu0 %v2935_v2  ;;  %1971 = vmatprep.subr.mxu1 %v3186_v0 }
 0x52e   :  { %1134 = vmatpush1.msra.mxu0 %v2939_v3  ;;  %1972 = vmatpush3.msra.mxu1 %v2942_v4 }
 0x52f   :  { %1135 = vmatprep.subr.mxu0 %v2945_v5  ;;  %1973 = vmatprep.subr.mxu1 %v3186_v0 }
 0x530   :  { %1136 = vmatpush1.msra.mxu0 %v2949_v6  ;;  %1974 = vmatpush3.msra.mxu1 %v2952_v8 }
 0x531   :  { %1137 = vmatprep.subr.mxu0 %v2955_v9  ;;  %1975 = vmatprep.subr.mxu1 %v3186_v0 }
 0x532   :  { %1138 = vmatpush1.msra.mxu0 %v2959_v10  ;;  %1976 = vmatpush3.msra.mxu1 %v2962_v11 }
 0x533   :  { %1139 = vmatprep.subr.mxu0 %v2965_v12  ;;  %1977 = vmatprep.subr.mxu1 %v3186_v0 }
 0x534   :  { %1140 = vmatpush1.msra.mxu0 %v2969_v13  ;;  %1978 = vmatpush3.msra.mxu1 %v2972_v14 }
 0x535   :  { %1141 = vmatprep.subr.mxu0 %v2975_v15  ;;  %1979 = vmatprep.subr.mxu1 %v3186_v0 }
 0x536   :  { %1142 = vmatpush1.msra.mxu0 %v2979_v16  ;;  %1175 = vmatprep.mubr.f32.mxu0 %v3186_v0 }
 0x537   :  { %1980 = vmatpush3.msra.mxu1 %v2983_v17  ;;  %1981 = vmatprep.mubr.msk.f32.mxu1 %vm2237_vm0, %v3186_v0 }
 0x538   :  { %1280 = vmatprep.subr.mxu0 %v2816_v7  ;;  %1984 = vmatprep.subr.mxu1 %v3186_v0 }
 0x5d7   :  { %v1008_v19 = vpop.f32.mrf.mxu0  ;;  %v1079_v20 = vpop.f32.mrf.mxu1 }
 0x5d8   :  { %v1083_v21 = vadd.f32 %v1576_v18, %v1008_v19  ;;  %v1100_v17 = vadd.f32 %v2515_v62, %v1079_v20  ;;  %v3211_v62 = vld [vmem:[#allocation9_spill] sm:$0xff] }
 0x5d9   :  { %v1948_v22 = vpop.f32.mrf.mxu1  ;;  %v1010_v25 = vpop.f32.mrf.mxu0 }
 0x5da   :  { %v1577_v23 = vmul.f32 -1.442695, %v1083_v21  ;;  %v1093_v26 = vadd.f32 %v1091_v24, %v1010_v25 }
 0x5dc   :  { %2110 = vpow2.f32 %v1577_v23  ;;  %v1578_v27 = vmul.f32 -1.442695, %v1093_v26 }
 0x5de   :  { %2112 = vpow2.f32 %v1578_v27 }
 0x5e9   :  { %v2111_v28 = vpop.eup %2110 }
 0x5ea   :  { %v1087_v29 = vadd.f32 1.0, %v2111_v28 }
 0x5eb   :  { %v2113_v7 = vpop.eup %2112 }
 0x5ec   :  { %2114 = vrcp.f32 %v1087_v29  ;;  %v1097_v13 = vadd.f32 1.0, %v2113_v7 }
 0x5f9   :  { %v2115_v16 = vpop.eup %2114 }
 0x5fa   :  { %v1101_v15 = vmul.f32 %v2115_v16, %v1100_v17 }
 0x5fc   :  { %v1104_v14 = vadd.f32 %v1102_v30, %v1101_v15  ;;  %v1582_v15 = vld [vmem:[%s3155_s0 + $0x2a] sm:$0x3f] }
 0x5fd   :  { %v1429_v26 = vrot.slane %v1582_v15, 2 }
 0x5fe   :  { %2116 = vtanh.f32 %v1104_v14  ;;  %v1451_v14 = vld [vmem:[%s3158_s3] sm:$0xff] }
 0x5ff   :  { %2118 = vrcp.f32 %v1097_v13  ;;  %v1452_v13 = vld [vmem:[%s3158_s3 + $0x8] sm:$0xff] }
 0x60b   :  { %v2117_v19 = vpop.eup %2116 }
 0x60c   :  { %v1106_v21 = vsub.f32 %v2825_v31, %v2117_v19  ;;  %v2119_v22 = vpop.eup %2118  ;;  %v3212_v31 = vld [vmem:[#allocation10_spill] sm:$0xff] }
 0x60e   :  { %v1107_v23 = vmul.f32 %v2119_v22, %v1106_v21 }
 0x610   :  { %v2995_v24 = vadd.f32 %v2117_v19, %v1107_v23  ;;  %v1440_v19 = vrot.slane %v1582_v15, 4 }
 0x612   :  { %1176 = vmatmul.mubr.f32.vlgmr.msra.gmra.mxu0 %v2995_v24  ;;  %1982 = vmatmul.mubr.f32.vlgmr.msra.gmra.mxu1 %v2995_v24 }
 0x613   :  { %1281 = vmatpush1.msra.mxu0 %v2829_v32  ;;  %1985 = vmatpush3.msra.mxu1 %v2832_v33  ;;  %v3213_v32 = vld [vmem:[#allocation13_spill] sm:$0xff]  ;;  %v3214_v33 = vld [vmem:[#allocation11_spill] sm:$0xff] }
 0x614   :  { %1282 = vmatprep.subr.mxu0 %v2835_v34  ;;  %1986 = vmatprep.subr.mxu1 %v3186_v0  ;;  %v3215_v34 = vld [vmem:[#allocation12_spill] sm:$0xff] }
 0x615   :  { %1283 = vmatpush1.msra.mxu0 %v2839_v35  ;;  %1987 = vmatpush3.msra.mxu1 %v2842_v36  ;;  %v1579_v35 = vld [vmem:[%s3155_s0 + $0x24] sm:$0x3f] }
 0x616   :  { %1284 = vmatprep.subr.mxu0 %v2845_v37  ;;  %1988 = vmatprep.subr.mxu1 %v3186_v0 }
 0x617   :  { %1285 = vmatpush1.msra.mxu0 %v2849_v38  ;;  %1989 = vmatpush3.msra.mxu1 %v2852_v39 }
 0x618   :  { %1286 = vmatprep.subr.mxu0 %v2855_v42  ;;  %1990 = vmatprep.subr.mxu1 %v3186_v0 }
 0x619   :  { %1287 = vmatpush1.msra.mxu0 %v2859_v45  ;;  %1991 = vmatpush3.msra.mxu1 %v2862_v46  ;;  %v1260_v45 = vrot.slane %v1579_v35, 2 }
 0x61a   :  { %1288 = vmatprep.subr.mxu0 %v2865_v47  ;;  %1992 = vmatprep.subr.mxu1 %v3186_v0 }
 0x61b   :  { %1289 = vmatpush1.msra.mxu0 %v2869_v55  ;;  %1993 = vmatpush3.msra.mxu1 %v2872_v51 }
 0x61c   :  { %1290 = vmatprep.subr.mxu0 %v2875_v40  ;;  %1994 = vmatprep.subr.mxu1 %v3186_v0 }
 0x61d   :  { %1291 = vmatpush1.msra.mxu0 %v2879_v41  ;;  %1995 = vmatpush3.msra.mxu1 %v2882_v43  ;;  %v1271_v43 = vrot.slane %v1579_v35, 4 }
 0x61e   :  { %1292 = vmatprep.subr.mxu0 %v2885_v48  ;;  %1996 = vmatprep.subr.mxu1 %v3186_v0  ;;  %v3071_v48 = vld [vmem:[%s3157_s2] ss:$0 sm:$0xff] }
 0x61f   :  { %1293 = vmatpush1.msra.mxu0 %v2889_v1  ;;  %1997 = vmatpush3.msra.mxu1 %v2892_v56 }
 0x620   :  { %1294 = vmatprep.subr.mxu0 %v2895_v61  ;;  %1998 = vmatprep.subr.mxu1 %v3186_v0 }
 0x621   :  { %1295 = vmatpush1.msra.mxu0 %v2899_v63  ;;  %1999 = vmatpush3.msra.mxu1 %v2902_v49 }
 0x622   :  { %1296 = vmatprep.subr.mxu0 %v2905_v52  ;;  %2000 = vmatprep.subr.mxu1 %v3186_v0 }
 0x623   :  { %1297 = vmatpush1.msra.mxu0 %v2909_v53  ;;  %2001 = vmatpush3.msra.mxu1 %v2912_v54 }
 0x624   :  { %1298 = vmatprep.subr.mxu0 %v2915_v59  ;;  %2002 = vmatprep.subr.mxu1 %v3186_v0 }
 0x625   :  { %1299 = vmatpush1.msra.mxu0 %v2919_v44  ;;  %2003 = vmatpush3.msra.mxu1 %v2922_v57  ;;  %v1466_v57 = vld [vmem:[%s3158_s3 + $0x78] sm:$0xff] }
 0x626   :  { %1300 = vmatprep.subr.mxu0 %v2925_v58  ;;  %2004 = vmatprep.subr.mxu1 %v3186_v0  ;;  %v1465_v58 = vld [vmem:[%s3158_s3 + $0x70] sm:$0xff] }
 0x627   :  { %1301 = vmatpush1.msra.mxu0 %v2929_v50  ;;  %2005 = vmatpush3.msra.mxu1 %v2932_v60  ;;  %v1464_v50 = vld [vmem:[%s3158_s3 + $0x68] sm:$0xff]  ;;  %v1463_v60 = vld [vmem:[%s3158_s3 + $0x60] sm:$0xff] }
 0x628   :  { %1302 = vmatprep.subr.mxu0 %v2935_v2  ;;  %2006 = vmatprep.subr.mxu1 %v3186_v0  ;;  %v1462_v2 = vld [vmem:[%s3158_s3 + $0x58] sm:$0xff] }
 0x629   :  { %1303 = vmatpush1.msra.mxu0 %v2939_v3  ;;  %2007 = vmatpush3.msra.mxu1 %v2942_v4  ;;  %v1461_v3 = vld [vmem:[%s3158_s3 + $0x50] sm:$0xff]  ;;  %v1460_v4 = vld [vmem:[%s3158_s3 + $0x48] sm:$0xff] }
 0x62a   :  { %1304 = vmatprep.subr.mxu0 %v2945_v5  ;;  %2008 = vmatprep.subr.mxu1 %v3186_v0  ;;  %v1459_v5 = vld [vmem:[%s3158_s3 + $0x40] sm:$0xff] }
 0x62b   :  { %1305 = vmatpush1.msra.mxu0 %v2949_v6  ;;  %2009 = vmatpush3.msra.mxu1 %v2952_v8  ;;  %v1458_v6 = vld [vmem:[%s3158_s3 + $0x38] sm:$0xff]  ;;  %v1457_v8 = vld [vmem:[%s3158_s3 + $0x30] sm:$0xff] }
 0x62c   :  { %1306 = vmatprep.subr.mxu0 %v2955_v9  ;;  %2010 = vmatprep.subr.mxu1 %v3186_v0  ;;  %v1456_v9 = vld [vmem:[%s3158_s3 + $0x28] sm:$0xff] }
 0x62d   :  { %1307 = vmatpush1.msra.mxu0 %v2959_v10  ;;  %2011 = vmatpush3.msra.mxu1 %v2962_v11  ;;  %v1455_v10 = vld [vmem:[%s3158_s3 + $0x20] sm:$0xff]  ;;  %v1454_v11 = vld [vmem:[%s3158_s3 + $0x18] sm:$0xff] }
 0x62e   :  { %1308 = vmatprep.subr.mxu0 %v2965_v12  ;;  %2012 = vmatprep.subr.mxu1 %v3186_v0  ;;  %v1453_v12 = vld [vmem:[%s3158_s3 + $0x10] sm:$0xff] }
 0x62f   :  { %1309 = vmatpush1.msra.mxu0 %v3211_v62  ;;  %2013 = vmatpush3.msra.mxu1 %v3212_v31 }
 0x630   :  { %1310 = vmatprep.subr.mxu0 %v3213_v32  ;;  %2014 = vmatprep.subr.mxu1 %v3186_v0 }
 0x631   :  { %1311 = vmatpush1.msra.mxu0 %v3214_v33  ;;  %1344 = vmatprep.mubr.f32.mxu0 %v3186_v0 }
 0x632   :  { %2015 = vmatpush3.msra.mxu1 %v3215_v34  ;;  %2016 = vmatprep.mubr.msk.f32.mxu1 %vm2237_vm0, %v3186_v0 }
 0x633   :  { %2019 = vmatprep.subr.mxu0 %v3186_v0 }
 0x6d2   :  { %v1177_v36 = vpop.f32.mrf.mxu0  ;;  %v1248_v37 = vpop.f32.mrf.mxu1 }
 0x6d3   :  { %v1252_v38 = vadd.f32 %v1579_v35, %v1177_v36  ;;  %v1269_v1 = vadd.f32 %v3071_v48, %v1248_v37  ;;  %v1585_v36 = vld [vmem:[%s3159_s4] ss:$0 sm:$0xff] }
 0x6d4   :  { %v1983_v39 = vpop.f32.mrf.mxu1  ;;  %v1179_v46 = vpop.f32.mrf.mxu0 }
 0x6d5   :  { %v1580_v42 = vmul.f32 -1.442695, %v1252_v38  ;;  %v1262_v47 = vadd.f32 %v1260_v45, %v1179_v46 }
 0x6d7   :  { %2120 = vpow2.f32 %v1580_v42  ;;  %v1581_v55 = vmul.f32 -1.442695, %v1262_v47 }
 0x6d9   :  { %2122 = vpow2.f32 %v1581_v55 }
 0x6e4   :  { %v2121_v51 = vpop.eup %2120 }
 0x6e5   :  { %v1256_v40 = vadd.f32 1.0, %v2121_v51 }
 0x6e6   :  { %v2123_v41 = vpop.eup %2122 }
 0x6e7   :  { %2124 = vrcp.f32 %v1256_v40  ;;  %v1266_v49 = vadd.f32 1.0, %v2123_v41 }
 0x6f4   :  { %v2125_v56 = vpop.eup %2124 }
 0x6f5   :  { %v1270_v61 = vmul.f32 %v2125_v56, %v1269_v1 }
 0x6f7   :  { %v1273_v63 = vadd.f32 %v1271_v43, %v1270_v61 }
 0x6f9   :  { %2126 = vtanh.f32 %v1273_v63 }
 0x6fa   :  { %2128 = vrcp.f32 %v1266_v49 }
 0x706   :  { %v2127_v52 = vpop.eup %2126 }
 0x707   :  { %v1275_v53 = vsub.f32 %v2995_v24, %v2127_v52  ;;  %v2129_v54 = vpop.eup %2128 }
 0x709   :  { %v1276_v59 = vmul.f32 %v2129_v54, %v1275_v53 }
 0x70b   :  { %v3075_v44 = vadd.f32 %v2127_v52, %v1276_v59 }
 0x70d   :  { %1345 = vmatmul.mubr.f32.vlgmr.msra.gmra.mxu0 %v3075_v44  ;;  %2017 = vmatmul.mubr.f32.vlgmr.msra.gmra.mxu1 %v3075_v44 }
 0x70e   :  { %2051 = vmatprep.mubr.msk.f32.mxu0 %vm2237_vm0, %v3186_v0  ;;  %2020 = vmatpush3.msra.mxu0 %v1466_v57 }
 0x70f   :  { %2021 = vmatprep.subr.mxu0 %v3186_v0 }
 0x710   :  { %2022 = vmatpush3.msra.mxu0 %v1465_v58 }
 0x711   :  { %2023 = vmatprep.subr.mxu0 %v3186_v0 }
 0x712   :  { %2024 = vmatpush3.msra.mxu0 %v1464_v50 }
 0x713   :  { %2025 = vmatprep.subr.mxu0 %v3186_v0 }
 0x714   :  { %2026 = vmatpush3.msra.mxu0 %v1463_v60 }
 0x715   :  { %2027 = vmatprep.subr.mxu0 %v3186_v0 }
 0x716   :  { %2028 = vmatpush3.msra.mxu0 %v1462_v2 }
 0x717   :  { %2029 = vmatprep.subr.mxu0 %v3186_v0 }
 0x718   :  { %2030 = vmatpush3.msra.mxu0 %v1461_v3 }
 0x719   :  { %2031 = vmatprep.subr.mxu0 %v3186_v0 }
 0x71a   :  { %2032 = vmatpush3.msra.mxu0 %v1460_v4 }
 0x71b   :  { %2033 = vmatprep.subr.mxu0 %v3186_v0 }
 0x71c   :  { %2034 = vmatpush3.msra.mxu0 %v1459_v5 }
 0x71d   :  { %2035 = vmatprep.subr.mxu0 %v3186_v0 }
 0x71e   :  { %2036 = vmatpush3.msra.mxu0 %v1458_v6 }
 0x71f   :  { %2037 = vmatprep.subr.mxu0 %v3186_v0 }
 0x720   :  { %2038 = vmatpush3.msra.mxu0 %v1457_v8 }
 0x721   :  { %2039 = vmatprep.subr.mxu0 %v3186_v0 }
 0x722   :  { %2040 = vmatpush3.msra.mxu0 %v1456_v9 }
 0x723   :  { %2041 = vmatprep.subr.mxu0 %v3186_v0 }
 0x724   :  { %2042 = vmatpush3.msra.mxu0 %v1455_v10 }
 0x725   :  { %2043 = vmatprep.subr.mxu0 %v3186_v0 }
 0x726   :  { %2044 = vmatpush3.msra.mxu0 %v1454_v11 }
 0x727   :  { %2045 = vmatprep.subr.mxu0 %v3186_v0 }
 0x728   :  { %2046 = vmatpush3.msra.mxu0 %v1453_v12 }
 0x729   :  { %2047 = vmatprep.subr.mxu0 %v3186_v0 }
 0x72a   :  { %2048 = vmatpush3.msra.mxu0 %v1452_v13 }
 0x72b   :  { %2049 = vmatprep.subr.mxu0 %v3186_v0 }
 0x72c   :  { %2050 = vmatpush3.msra.mxu0 %v1451_v14 }
 0x7cd   :  { %v1346_v16 = vpop.f32.mrf.mxu0  ;;  %v1417_v17 = vpop.f32.mrf.mxu1 }
 0x7ce   :  { %v1421_v18 = vadd.f32 %v1582_v15, %v1346_v16  ;;  %v1438_v21 = vadd.f32 %v3071_v48, %v1417_v17 }
 0x7cf   :  { %v2018_v20 = vpop.f32.mrf.mxu1  ;;  %v1348_v27 = vpop.f32.mrf.mxu0 }
 0x7d0   :  { %v1583_v25 = vmul.f32 -1.442695, %v1421_v18  ;;  %v1431_v28 = vadd.f32 %v1429_v26, %v1348_v27 }
 0x7d2   :  { %2130 = vpow2.f32 %v1583_v25  ;;  %v1584_v29 = vmul.f32 -1.442695, %v1431_v28 }
 0x7d4   :  { %2132 = vpow2.f32 %v1584_v29 }
 0x7df   :  { %v2131_v7 = vpop.eup %2130 }
 0x7e0   :  { %v1425_v30 = vadd.f32 1.0, %v2131_v7 }
 0x7e1   :  { %v2133_v0 = vpop.eup %2132 }
 0x7e2   :  { %2134 = vrcp.f32 %v1425_v30  ;;  %v1435_v62 = vadd.f32 1.0, %v2133_v0 }
 0x7ef   :  { %v2135_v22 = vpop.eup %2134 }
 0x7f0   :  { %v1439_v23 = vmul.f32 %v2135_v22, %v1438_v21 }
 0x7f2   :  { %v1442_v24 = vadd.f32 %v1440_v19, %v1439_v23 }
 0x7f4   :  { %2136 = vtanh.f32 %v1442_v24 }
 0x7f5   :  { %2138 = vrcp.f32 %v1435_v62 }
 0x801   :  { %v2137_v31 = vpop.eup %2136 }
 0x802   :  { %v1444_v32 = vsub.f32 %v3075_v44, %v2137_v31  ;;  %v2139_v33 = vpop.eup %2138 }
 0x804   :  { %v1445_v34 = vmul.f32 %v2139_v33, %v1444_v32 }
 0x806   :  { %v1446_v35 = vadd.f32 %v2137_v31, %v1445_v34 }
 0x808   :  { %1447 = vst [vmem:[#allocation2] sm:$0x3] %v1446_v35  ;;  %2052 = vmatmul.mubr.f32.vlgmr.msra.gmra.mxu0 %v1446_v35 }
 0x8c8   :  { %v1540_v37 = vpop.f32.mrf.mxu0 }
 0x8c9   :  { %v1541_v38 = vadd.f32 %v1585_v36, %v1540_v37 }
 0x8ca   :  { %v2053_v39 = vpop.f32.mrf.mxu0 }
 0x8cb   :  { %1545 = vst.msk [vmem:[#allocation6] sm:$0x3] %vm1544_vm1, %v1541_v38 }
 0x8cc   :  { %2220 = shalt.err (!%p2217_p9)
}
 0x8cd   :  { %1555 = dma.vmem_to_hbm [thread:$0]  %s1553_s24, 32, %s3160_s5, [#allocation5]  }
 0x8ce   :  { %2231 = dma.done.wait [#allocation5], 32  }
 0x8cf   :  { %2232 = vsyncadd [#allocation5], 4294967264 }
 0x8d0   :  { %1559 = vsyncpa [#allocation4], 1 }
 0x8d1   :  { %1560 = vsyncpa [#allocation5], 1 }

</bundles_post_ra>
